<compile_context>
chip_gen: v5e
topology: v5e:2x2
jax: 0.10.0
libtpu: 0.0.40
codegen_flags: <defaults>
</compile_context>

<pallas_src>
import numpy as np

import jax
import jax.numpy as jnp
from jax.experimental import pallas as pl
from jax.experimental.pallas import tpu as pltpu

# ------------------------- config (small synthetic MAE) -------------------------
B = 2
C = 3
IMG = 16
PATCH = 4
NUM_PATCHES = (IMG // PATCH) ** 2          # 16
PATCH_DIM = PATCH * PATCH * C              # 48 == pixel_values_per_patch

ENC_DIM = 32
ENC_DEPTH = 1
ENC_HEADS = 2
ENC_DIM_HEAD = 16
ENC_MLP = ENC_DIM * 4

DEC_DIM = 16                               # != ENC_DIM -> enc_to_dec is a Linear
DEC_DEPTH = 1
DEC_HEADS = 2
DEC_DIM_HEAD = 8
DEC_MLP = DEC_DIM * 4

MASK_RATIO = 0.75
NUM_MASKED = int(MASK_RATIO * NUM_PATCHES)       # 12
NUM_UNMASKED = NUM_PATCHES - NUM_MASKED          # 4
LN_EPS = 1e-5
LANES = 128


# ----------------------------- parameter slab packing ----------------------------
class ParamSlab:
    """Packs many tiny (rows, cols<=128) f32 params into one lane-dense (R, 128)
    slab so the fused kernel needs a single weight input / DMA.  In-kernel reads
    are static ref slices at 8-row-aligned offsets."""

    def __init__(self):
        self._entries = {}     # name -> (row_offset, rows, cols)
        self._pending = []     # (row_offset, np_array)
        self._rows = 0

    def add(self, name, arr):
        a = np.asarray(arr, np.float32)
        if a.ndim == 1:
            a = a.reshape(1, -1)
        r, c = a.shape
        assert c <= LANES, name
        self._entries[name] = (self._rows, r, c)
        self._pending.append((self._rows, a))
        self._rows += -(-r // 8) * 8           # keep every entry 8-row aligned

    def build(self):
        total = max(8, -(-self._rows // 8) * 8)
        buf = np.zeros((total, LANES), np.float32)
        for off, a in self._pending:
            buf[off:off + a.shape[0], :a.shape[1]] = a
        return jnp.asarray(buf)

    def read(self, ref, name, row0=0, nrows=None):
        off, r, c = self._entries[name]
        if nrows is None:
            nrows = r
        return ref[off + row0: off + row0 + nrows, :c]


def init_params(key):
    keys = iter(jax.random.split(key, 64))

    def nrm(shape, scale=0.02):
        return np.asarray(scale * jax.random.normal(next(keys), shape), np.float32)

    slab = ParamSlab()
    slab.add("patch_w", nrm((PATCH_DIM, ENC_DIM)))
    slab.add("patch_b", np.zeros((ENC_DIM,), np.float32))
    pos_full = nrm((NUM_PATCHES + 1, ENC_DIM))            # pos_embedding (incl. cls slot)
    slab.add("pos", pos_full[1:NUM_PATCHES + 1])

    def add_layer(pfx, dim, heads, dim_head, mlp):
        inner = heads * dim_head
        slab.add(pfx + "ln1_g", np.ones((dim,), np.float32))
        slab.add(pfx + "ln1_b", np.zeros((dim,), np.float32))
        slab.add(pfx + "qkv_w", nrm((dim, 3 * inner)))       # to_qkv has no bias
        slab.add(pfx + "out_w", nrm((inner, dim)))
        slab.add(pfx + "out_b", np.zeros((dim,), np.float32))
        slab.add(pfx + "ln2_g", np.ones((dim,), np.float32))
        slab.add(pfx + "ln2_b", np.zeros((dim,), np.float32))
        slab.add(pfx + "ff1_w", nrm((dim, mlp)))
        slab.add(pfx + "ff1_b", np.zeros((mlp,), np.float32))
        slab.add(pfx + "ff2_w", nrm((mlp, dim)))
        slab.add(pfx + "ff2_b", np.zeros((dim,), np.float32))

    for l in range(ENC_DEPTH):
        add_layer(f"enc{l}_", ENC_DIM, ENC_HEADS, ENC_DIM_HEAD, ENC_MLP)

    slab.add("e2d_w", nrm((ENC_DIM, DEC_DIM)))
    slab.add("e2d_b", np.zeros((DEC_DIM,), np.float32))
    slab.add("mask_token", nrm((DEC_DIM,), 1.0))
    slab.add("dec_pos", nrm((NUM_PATCHES, DEC_DIM), 1.0))

    for l in range(DEC_DEPTH):
        add_layer(f"dec{l}_", DEC_DIM, DEC_HEADS, DEC_DIM_HEAD, DEC_MLP)

    slab.add("pix_w", nrm((DEC_DIM, PATCH_DIM)))
    slab.add("pix_b", np.zeros((PATCH_DIM,), np.float32))

    return slab, slab.build()


# ------------------------------- fused MAE kernel --------------------------------
def build_fused_forward(slab, slab_rows):
    rd = slab.read

    def layernorm(x, g, b):
        mu = jnp.mean(x, axis=-1, keepdims=True)
        ms = jnp.mean(x * x, axis=-1, keepdims=True)
        return (x - mu) * jax.lax.rsqrt(ms - mu * mu + LN_EPS) * g + b

    def gather_onehot(idx_ref, bidx, rows, n):
        """(rows, n) one-hot G with G[j, idx[bidx, j]] = 1  (gather = G @ X)."""
        row_ids = jax.lax.broadcasted_iota(jnp.int32, (rows, n), 0)
        col_ids = jax.lax.broadcasted_iota(jnp.int32, (rows, n), 1)
        tgt = jnp.full((rows, n), -1, jnp.int32)
        for j in range(rows):
            tgt = jnp.where(row_ids == j, idx_ref[bidx, j], tgt)
        return (col_ids == tgt).astype(jnp.float32)

    def scatter_onehot(idx_ref, bidx, n, cols):
        """(n, cols) one-hot S with S[idx[bidx, j], j] = 1  (scatter = S @ X)."""
        row_ids = jax.lax.broadcasted_iota(jnp.int32, (n, cols), 0)
        col_ids = jax.lax.broadcasted_iota(jnp.int32, (n, cols), 1)
        tgt = jnp.full((n, cols), -1, jnp.int32)
        for j in range(cols):
            tgt = jnp.where(col_ids == j, idx_ref[bidx, j], tgt)
        return (row_ids == tgt).astype(jnp.float32)

    def layer(x, p_ref, pfx, heads, dim_head):
        """PreNorm transformer block: x = x + attn(LN1 x); x = x + ff(LN2 x)."""
        t, d = x.shape
        inner = heads * dim_head
        scale = dim_head ** -0.5

        xn = layernorm(x, rd(p_ref, pfx + "ln1_g"), rd(p_ref, pfx + "ln1_b"))
        # single lane-dense qkv slab; to_qkv has bias=False in the reference
        qkv = jnp.dot(xn, rd(p_ref, pfx + "qkv_w"),
                      preferred_element_type=jnp.float32)            # (t, 3*inner)

        attn = jnp.zeros((t, d), jnp.float32)
        for h in range(heads):                                       # heads=2, static
            q = qkv[:, h * dim_head:(h + 1) * dim_head]
            k = qkv[:, inner + h * dim_head: inner + (h + 1) * dim_head]
            v = qkv[:, 2 * inner + h * dim_head: 2 * inner + (h + 1) * dim_head]
            s = jax.lax.dot_general(q, k, (((1,), (1,)), ((), ())),
                                    preferred_element_type=jnp.float32) * scale
            s = s - jnp.max(s, axis=-1, keepdims=True)
            e = jnp.exp(s)
            p = e * pl.reciprocal(jnp.sum(e, axis=-1, keepdims=True), approx=True)
            oh = jnp.dot(p, v, preferred_element_type=jnp.float32)   # (t, dim_head)
            # fold output projection into per-head partial sums (no lane concat)
            ow_h = rd(p_ref, pfx + "out_w", h * dim_head, dim_head)  # (dim_head, d)
            attn = attn + jnp.dot(oh, ow_h, preferred_element_type=jnp.float32)

        x1 = x + attn + rd(p_ref, pfx + "out_b")

        xn2 = layernorm(x1, rd(p_ref, pfx + "ln2_g"), rd(p_ref, pfx + "ln2_b"))
        # TODO(synk): torch nn.GELU defaults to exact erf; tanh approximation used here.
        h1 = jax.nn.gelu(jnp.dot(xn2, rd(p_ref, pfx + "ff1_w"),
                                 preferred_element_type=jnp.float32)
                         + rd(p_ref, pfx + "ff1_b"), approximate=True)
        x2 = x1 + jnp.dot(h1, rd(p_ref, pfx + "ff2_w"),
                          preferred_element_type=jnp.float32) + rd(p_ref, pfx + "ff2_b")
        return x2

    inv = 1.0 / float(B * NUM_MASKED * PATCH_DIM)

    def kernel(midx_ref, uidx_ref, patches_ref, p_ref, loss_ref):
        bidx = pl.program_id(0)
        patches = patches_ref[0]                                       # (N, PATCH_DIM)

        # patch embedding + positional add (all patches, as in the reference)
        tokens = (jnp.dot(patches, rd(p_ref, "patch_w"),
                          preferred_element_type=jnp.float32)
                  + rd(p_ref, "patch_b") + rd(p_ref, "pos"))           # (N, ENC_DIM)

        # gather unmasked tokens with a one-hot MXU matmul (indices from SMEM)
        u_gather = gather_onehot(uidx_ref, bidx, NUM_UNMASKED, NUM_PATCHES)   # (nu, N)
        x = jnp.dot(u_gather, tokens, preferred_element_type=jnp.float32)     # (nu, E)

        for l in range(ENC_DEPTH):
            x = layer(x, p_ref, f"enc{l}_", ENC_HEADS, ENC_DIM_HEAD)

        # enc_to_dec projection
        e2d = (jnp.dot(x, rd(p_ref, "e2d_w"), preferred_element_type=jnp.float32)
               + rd(p_ref, "e2d_b"))                                   # (nu, DEC_DIM)

        # scatter into the full decoder sequence:
        #   unmasked rows <- e2d, masked rows <- mask_token, all rows + dec_pos
        u_scatter = scatter_onehot(uidx_ref, bidx, NUM_PATCHES, NUM_UNMASKED)  # (N, nu)
        unmask_ind = jnp.sum(u_scatter, axis=-1, keepdims=True)                # (N, 1)
        dec_tok = (jnp.dot(u_scatter, e2d, preferred_element_type=jnp.float32)
                   + (1.0 - unmask_ind) * rd(p_ref, "mask_token")
                   + rd(p_ref, "dec_pos"))                             # (N, DEC_DIM)

        y = dec_tok
        for l in range(DEC_DEPTH):
            y = layer(y, p_ref, f"dec{l}_", DEC_HEADS, DEC_DIM_HEAD)

        # gather masked rows, predict pixels, per-batch partial MSE
        m_gather = gather_onehot(midx_ref, bidx, NUM_MASKED, NUM_PATCHES)      # (nm, N)
        masked_dec = jnp.dot(m_gather, y, preferred_element_type=jnp.float32)  # (nm, DEC_DIM)
        pred = (jnp.dot(masked_dec, rd(p_ref, "pix_w"),
                        preferred_element_type=jnp.float32)
                + rd(p_ref, "pix_b"))                                   # (nm, PATCH_DIM)
        tgt = jnp.dot(m_gather, patches, preferred_element_type=jnp.float32)   # (nm, PATCH_DIM)
        diff = pred - tgt
        loss_ref[0] = jnp.sum(diff * diff, axis=(0, 1), keepdims=True) * inv

    grid_spec = pltpu.PrefetchScalarGridSpec(
        num_scalar_prefetch=2,                       # masked_idx, unmasked_idx -> SMEM
        grid=(B,),
        in_specs=[
            pl.BlockSpec((1, NUM_PATCHES, PATCH_DIM), lambda b, mi, ui: (b, 0, 0)),
            pl.BlockSpec((slab_rows, LANES), lambda b, mi, ui: (0, 0)),
        ],
        out_specs=pl.BlockSpec((1, 1, 1), lambda b, mi, ui: (b, 0, 0)),
    )

    return pl.pallas_call(
        kernel,
        out_shape=jax.ShapeDtypeStruct((B, 1, 1), jnp.float32),
        grid_spec=grid_spec,
        compiler_params=pltpu.CompilerParams(dimension_semantics=("parallel",)),
    )


# --------------------------------- forward pass ----------------------------------
def patchify(img, p):
    # 'b c (h p1) (w p2) -> b (h w) (p1 p2 c)'  (pure layout; stays in XLA)
    b, c, hh, ww = img.shape
    h, w = hh // p, ww // p
    x = img.reshape(b, c, h, p, w, p)
    x = x.transpose(0, 2, 4, 3, 5, 1)
    return x.reshape(b, h * w, p * p * c)


def make_mae_forward(slab, slab_rows):
    fused = build_fused_forward(slab, slab_rows)

    def forward(slab_arr, img, key):
        patches = patchify(img, PATCH)
        # random masking (torch.rand(...).argsort(-1) equivalent); indices feed SMEM
        rand_indices = jnp.argsort(
            jax.random.uniform(key, (B, NUM_PATCHES)), axis=-1).astype(jnp.int32)
        masked_idx = rand_indices[:, :NUM_MASKED]
        unmasked_idx = rand_indices[:, NUM_MASKED:]
        partial = fused(masked_idx, unmasked_idx, patches, slab_arr)   # (B,1,1) partial sums
        return jnp.sum(partial)       # 1/(B*nm*patch_dim) factor already applied in-kernel

    return forward


if __name__ == "__main__":
    key = jax.random.PRNGKey(0)
    pkey, ikey, mkey = jax.random.split(key, 3)

    slab, slab_arr = init_params(pkey)
    img = jax.random.normal(ikey, (B, C, IMG, IMG), dtype=jnp.float32)

    mae_forward = jax.jit(make_mae_forward(slab, slab_arr.shape[0]))
    loss = mae_forward(slab_arr, img, mkey)
    jax.block_until_ready(loss)

    assert loss.shape == () and bool(jnp.isfinite(loss))
    print("KERNEL_OK")
</pallas_src>

<mosaic_0001>
module attributes {stable_mosaic.version = 11 : i64} {
  func.func @kernel(%arg0: i32, %arg1: memref<2x12xi32, #tpu.memory_space<smem>>, %arg2: memref<2x4xi32, #tpu.memory_space<smem>>, %arg3: memref<1x16x48xf32, #tpu.memory_space<vmem>>, %arg4: memref<608x128xf32, #tpu.memory_space<vmem>>, %arg5: memref<1x1x1xf32, #tpu.memory_space<vmem>>) attributes {dimension_semantics = [#tpu.dimension_semantics<parallel>], iteration_bounds = array<i64: 2>, scalar_prefetch = 2 : i64, scratch_operands = 0 : i64, tpu.core_type = #tpu.core_type<tc>, window_params = [{transform_indices = @transform_0, window_bounds = array<i64: 1, 16, 48>}, {pipeline_mode = #tpu.pipeline_mode<synchronous>, transform_indices = @transform_1, window_bounds = array<i64: 608, 128>}, {transform_indices = @transform_2, window_bounds = array<i64: 1, 1, 1>}]} {
    %c0 = arith.constant 0 : index
    %c0_0 = arith.constant 0 : index
    %c0_1 = arith.constant 0 : index
    %0 = vector.load %arg3[%c0, %c0_0, %c0_1] : memref<1x16x48xf32, #tpu.memory_space<vmem>>, vector<1x16x48xf32>
    %1 = vector.shape_cast %0 : vector<1x16x48xf32> to vector<16x48xf32>
    %c0_2 = arith.constant 0 : index
    %c0_3 = arith.constant 0 : index
    %2 = vector.load %arg4[%c0_2, %c0_3] : memref<608x128xf32, #tpu.memory_space<vmem>>, vector<48x32xf32>
    %cst = arith.constant dense<0.000000e+00> : vector<16x32xf32>
    %3 = tpu.matmul %1, %2, %cst {dimension_numbers = #tpu.dot_dimension_numbers<[1], [0], [0], [1], [0, 0, 1, 1], [], []>} : vector<16x48xf32>, vector<48x32xf32>, vector<16x32xf32> -> vector<16x32xf32>
    %c48 = arith.constant 48 : index
    %c0_4 = arith.constant 0 : index
    %4 = vector.load %arg4[%c48, %c0_4] : memref<608x128xf32, #tpu.memory_space<vmem>>, vector<1x32xf32>
    %5 = vector.broadcast %4 : vector<1x32xf32> to vector<16x32xf32>
    %6 = arith.addf %3, %5 : vector<16x32xf32>
    %c56 = arith.constant 56 : index
    %c0_5 = arith.constant 0 : index
    %7 = vector.load %arg4[%c56, %c0_5] : memref<608x128xf32, #tpu.memory_space<vmem>>, vector<16x32xf32>
    %8 = arith.addf %6, %7 : vector<16x32xf32>
    %9 = tpu.iota {dimensions = array<i32: 0>} : vector<4x16xi32>
    %10 = tpu.iota {dimensions = array<i32: 1>} : vector<4x16xi32>
    %c-1_i32 = arith.constant -1 : i32
    %11 = vector.broadcast %c-1_i32 : i32 to vector<4x16xi32>
    %c0_i32 = arith.constant 0 : i32
    %12 = vector.broadcast %c0_i32 : i32 to vector<4x16xi32>
    %13 = arith.cmpi eq, %9, %12 : vector<4x16xi32>
    %14 = arith.index_cast %arg0 : i32 to index
    %c0_6 = arith.constant 0 : index
    %15 = memref.load %arg2[%14, %c0_6] : memref<2x4xi32, #tpu.memory_space<smem>>
    %16 = vector.broadcast %15 : i32 to vector<4x16xi32>
    %17 = arith.select %13, %16, %11 : vector<4x16xi1>, vector<4x16xi32>
    %c1_i32 = arith.constant 1 : i32
    %18 = vector.broadcast %c1_i32 : i32 to vector<4x16xi32>
    %19 = arith.cmpi eq, %9, %18 : vector<4x16xi32>
    %20 = arith.index_cast %arg0 : i32 to index
    %c1 = arith.constant 1 : index
    %21 = memref.load %arg2[%20, %c1] : memref<2x4xi32, #tpu.memory_space<smem>>
    %22 = vector.broadcast %21 : i32 to vector<4x16xi32>
    %23 = arith.select %19, %22, %17 : vector<4x16xi1>, vector<4x16xi32>
    %c2_i32 = arith.constant 2 : i32
    %24 = vector.broadcast %c2_i32 : i32 to vector<4x16xi32>
    %25 = arith.cmpi eq, %9, %24 : vector<4x16xi32>
    %26 = arith.index_cast %arg0 : i32 to index
    %c2 = arith.constant 2 : index
    %27 = memref.load %arg2[%26, %c2] : memref<2x4xi32, #tpu.memory_space<smem>>
    %28 = vector.broadcast %27 : i32 to vector<4x16xi32>
    %29 = arith.select %25, %28, %23 : vector<4x16xi1>, vector<4x16xi32>
    %c3_i32 = arith.constant 3 : i32
    %30 = vector.broadcast %c3_i32 : i32 to vector<4x16xi32>
    %31 = arith.cmpi eq, %9, %30 : vector<4x16xi32>
    %32 = arith.index_cast %arg0 : i32 to index
    %c3 = arith.constant 3 : index
    %33 = memref.load %arg2[%32, %c3] : memref<2x4xi32, #tpu.memory_space<smem>>
    %34 = vector.broadcast %33 : i32 to vector<4x16xi32>
    %35 = arith.select %31, %34, %29 : vector<4x16xi1>, vector<4x16xi32>
    %36 = arith.cmpi eq, %10, %35 : vector<4x16xi32>
    %37 = arith.extui %36 : vector<4x16xi1> to vector<4x16xi32>
    %38 = arith.sitofp %37 : vector<4x16xi32> to vector<4x16xf32>
    %cst_7 = arith.constant dense<0.000000e+00> : vector<4x32xf32>
    %39 = tpu.matmul %38, %8, %cst_7 {dimension_numbers = #tpu.dot_dimension_numbers<[1], [0], [0], [1], [0, 0, 1, 1], [], []>} : vector<4x16xf32>, vector<16x32xf32>, vector<4x32xf32> -> vector<4x32xf32>
    %c72 = arith.constant 72 : index
    %c0_8 = arith.constant 0 : index
    %40 = vector.load %arg4[%c72, %c0_8] : memref<608x128xf32, #tpu.memory_space<vmem>>, vector<1x32xf32>
    %c80 = arith.constant 80 : index
    %c0_9 = arith.constant 0 : index
    %41 = vector.load %arg4[%c80, %c0_9] : memref<608x128xf32, #tpu.memory_space<vmem>>, vector<1x32xf32>
    %cst_10 = arith.constant dense<0.000000e+00> : vector<4xf32>
    %42 = vector.multi_reduction <add>, %39, %cst_10 [1] : vector<4x32xf32> to vector<4xf32>
    %43 = vector.shape_cast %42 : vector<4xf32> to vector<4x1xf32>
    %cst_11 = arith.constant 3.200000e+01 : f32
    %44 = vector.broadcast %cst_11 : f32 to vector<4x1xf32>
    %45 = arith.divf %43, %44 : vector<4x1xf32>
    %46 = arith.mulf %39, %39 : vector<4x32xf32>
    %cst_12 = arith.constant dense<0.000000e+00> : vector<4xf32>
    %47 = vector.multi_reduction <add>, %46, %cst_12 [1] : vector<4x32xf32> to vector<4xf32>
    %48 = vector.shape_cast %47 : vector<4xf32> to vector<4x1xf32>
    %cst_13 = arith.constant 3.200000e+01 : f32
    %49 = vector.broadcast %cst_13 : f32 to vector<4x1xf32>
    %50 = arith.divf %48, %49 : vector<4x1xf32>
    %51 = vector.broadcast %45 : vector<4x1xf32> to vector<4x32xf32>
    %52 = arith.subf %39, %51 : vector<4x32xf32>
    %53 = arith.mulf %45, %45 : vector<4x1xf32>
    %54 = arith.subf %50, %53 : vector<4x1xf32>
    %cst_14 = arith.constant 9.99999974E-6 : f32
    %55 = vector.broadcast %cst_14 : f32 to vector<4x1xf32>
    %56 = arith.addf %54, %55 : vector<4x1xf32>
    %57 = math.rsqrt %56 : vector<4x1xf32>
    %58 = vector.broadcast %57 : vector<4x1xf32> to vector<4x32xf32>
    %59 = arith.mulf %52, %58 : vector<4x32xf32>
    %60 = vector.broadcast %40 : vector<1x32xf32> to vector<4x32xf32>
    %61 = arith.mulf %59, %60 : vector<4x32xf32>
    %62 = vector.broadcast %41 : vector<1x32xf32> to vector<4x32xf32>
    %63 = arith.addf %61, %62 : vector<4x32xf32>
    %c88 = arith.constant 88 : index
    %c0_15 = arith.constant 0 : index
    %64 = vector.load %arg4[%c88, %c0_15] : memref<608x128xf32, #tpu.memory_space<vmem>>, vector<32x96xf32>
    %cst_16 = arith.constant dense<0.000000e+00> : vector<4x96xf32>
    %65 = tpu.matmul %63, %64, %cst_16 {dimension_numbers = #tpu.dot_dimension_numbers<[1], [0], [0], [1], [0, 0, 1, 1], [], []>} : vector<4x32xf32>, vector<32x96xf32>, vector<4x96xf32> -> vector<4x96xf32>
    %cst_17 = arith.constant 0.000000e+00 : f32
    %66 = vector.broadcast %cst_17 : f32 to vector<4x32xf32>
    %67 = vector.extract_strided_slice %65 {offsets = [0, 0], sizes = [4, 16], strides = [1, 1]} : vector<4x96xf32> to vector<4x16xf32>
    %68 = vector.extract_strided_slice %65 {offsets = [0, 32], sizes = [4, 16], strides = [1, 1]} : vector<4x96xf32> to vector<4x16xf32>
    %69 = vector.extract_strided_slice %65 {offsets = [0, 64], sizes = [4, 16], strides = [1, 1]} : vector<4x96xf32> to vector<4x16xf32>
    %cst_18 = arith.constant dense<0.000000e+00> : vector<4x4xf32>
    %70 = tpu.matmul %67, %68, %cst_18 {dimension_numbers = #tpu.dot_dimension_numbers<[1], [1], [0], [0], [0, 0, 1, 0], [], []>} : vector<4x16xf32>, vector<4x16xf32>, vector<4x4xf32> -> vector<4x4xf32>
    %cst_19 = arith.constant 2.500000e-01 : f32
    %71 = vector.broadcast %cst_19 : f32 to vector<4x4xf32>
    %72 = arith.mulf %70, %71 : vector<4x4xf32>
    %cst_20 = arith.constant dense<0xFF800000> : vector<4xf32>
    %73 = vector.multi_reduction <maximumf>, %72, %cst_20 [1] : vector<4x4xf32> to vector<4xf32>
    %74 = vector.shape_cast %73 : vector<4xf32> to vector<4x1xf32>
    %75 = vector.broadcast %74 : vector<4x1xf32> to vector<4x4xf32>
    %76 = arith.subf %72, %75 : vector<4x4xf32>
    %77 = math.exp %76 : vector<4x4xf32>
    %cst_21 = arith.constant dense<0.000000e+00> : vector<4xf32>
    %78 = vector.multi_reduction <add>, %77, %cst_21 [1] : vector<4x4xf32> to vector<4xf32>
    %79 = vector.shape_cast %78 : vector<4xf32> to vector<4x1xf32>
    %80 = tpu.reciprocal %79 {approx = true} : vector<4x1xf32> -> vector<4x1xf32>
    %81 = vector.broadcast %80 : vector<4x1xf32> to vector<4x4xf32>
    %82 = arith.mulf %77, %81 : vector<4x4xf32>
    %cst_22 = arith.constant dense<0.000000e+00> : vector<4x16xf32>
    %83 = tpu.matmul %82, %69, %cst_22 {dimension_numbers = #tpu.dot_dimension_numbers<[1], [0], [0], [1], [0, 0, 1, 1], [], []>} : vector<4x4xf32>, vector<4x16xf32>, vector<4x16xf32> -> vector<4x16xf32>
    %c120 = arith.constant 120 : index
    %c0_23 = arith.constant 0 : index
    %84 = vector.load %arg4[%c120, %c0_23] : memref<608x128xf32, #tpu.memory_space<vmem>>, vector<16x32xf32>
    %cst_24 = arith.constant dense<0.000000e+00> : vector<4x32xf32>
    %85 = tpu.matmul %83, %84, %cst_24 {dimension_numbers = #tpu.dot_dimension_numbers<[1], [0], [0], [1], [0, 0, 1, 1], [], []>} : vector<4x16xf32>, vector<16x32xf32>, vector<4x32xf32> -> vector<4x32xf32>
    %86 = arith.addf %66, %85 : vector<4x32xf32>
    %87 = vector.extract_strided_slice %65 {offsets = [0, 16], sizes = [4, 16], strides = [1, 1]} : vector<4x96xf32> to vector<4x16xf32>
    %88 = vector.extract_strided_slice %65 {offsets = [0, 48], sizes = [4, 16], strides = [1, 1]} : vector<4x96xf32> to vector<4x16xf32>
    %89 = vector.extract_strided_slice %65 {offsets = [0, 80], sizes = [4, 16], strides = [1, 1]} : vector<4x96xf32> to vector<4x16xf32>
    %cst_25 = arith.constant dense<0.000000e+00> : vector<4x4xf32>
    %90 = tpu.matmul %87, %88, %cst_25 {dimension_numbers = #tpu.dot_dimension_numbers<[1], [1], [0], [0], [0, 0, 1, 0], [], []>} : vector<4x16xf32>, vector<4x16xf32>, vector<4x4xf32> -> vector<4x4xf32>
    %cst_26 = arith.constant 2.500000e-01 : f32
    %91 = vector.broadcast %cst_26 : f32 to vector<4x4xf32>
    %92 = arith.mulf %90, %91 : vector<4x4xf32>
    %cst_27 = arith.constant dense<0xFF800000> : vector<4xf32>
    %93 = vector.multi_reduction <maximumf>, %92, %cst_27 [1] : vector<4x4xf32> to vector<4xf32>
    %94 = vector.shape_cast %93 : vector<4xf32> to vector<4x1xf32>
    %95 = vector.broadcast %94 : vector<4x1xf32> to vector<4x4xf32>
    %96 = arith.subf %92, %95 : vector<4x4xf32>
    %97 = math.exp %96 : vector<4x4xf32>
    %cst_28 = arith.constant dense<0.000000e+00> : vector<4xf32>
    %98 = vector.multi_reduction <add>, %97, %cst_28 [1] : vector<4x4xf32> to vector<4xf32>
    %99 = vector.shape_cast %98 : vector<4xf32> to vector<4x1xf32>
    %100 = tpu.reciprocal %99 {approx = true} : vector<4x1xf32> -> vector<4x1xf32>
    %101 = vector.broadcast %100 : vector<4x1xf32> to vector<4x4xf32>
    %102 = arith.mulf %97, %101 : vector<4x4xf32>
    %cst_29 = arith.constant dense<0.000000e+00> : vector<4x16xf32>
    %103 = tpu.matmul %102, %89, %cst_29 {dimension_numbers = #tpu.dot_dimension_numbers<[1], [0], [0], [1], [0, 0, 1, 1], [], []>} : vector<4x4xf32>, vector<4x16xf32>, vector<4x16xf32> -> vector<4x16xf32>
    %c136 = arith.constant 136 : index
    %c0_30 = arith.constant 0 : index
    %104 = vector.load %arg4[%c136, %c0_30] : memref<608x128xf32, #tpu.memory_space<vmem>>, vector<16x32xf32>
    %cst_31 = arith.constant dense<0.000000e+00> : vector<4x32xf32>
    %105 = tpu.matmul %103, %104, %cst_31 {dimension_numbers = #tpu.dot_dimension_numbers<[1], [0], [0], [1], [0, 0, 1, 1], [], []>} : vector<4x16xf32>, vector<16x32xf32>, vector<4x32xf32> -> vector<4x32xf32>
    %106 = arith.addf %86, %105 : vector<4x32xf32>
    %107 = arith.addf %39, %106 : vector<4x32xf32>
    %c152 = arith.constant 152 : index
    %c0_32 = arith.constant 0 : index
    %108 = vector.load %arg4[%c152, %c0_32] : memref<608x128xf32, #tpu.memory_space<vmem>>, vector<1x32xf32>
    %109 = vector.broadcast %108 : vector<1x32xf32> to vector<4x32xf32>
    %110 = arith.addf %107, %109 : vector<4x32xf32>
    %c160 = arith.constant 160 : index
    %c0_33 = arith.constant 0 : index
    %111 = vector.load %arg4[%c160, %c0_33] : memref<608x128xf32, #tpu.memory_space<vmem>>, vector<1x32xf32>
    %c168 = arith.constant 168 : index
    %c0_34 = arith.constant 0 : index
    %112 = vector.load %arg4[%c168, %c0_34] : memref<608x128xf32, #tpu.memory_space<vmem>>, vector<1x32xf32>
    %cst_35 = arith.constant dense<0.000000e+00> : vector<4xf32>
    %113 = vector.multi_reduction <add>, %110, %cst_35 [1] : vector<4x32xf32> to vector<4xf32>
    %114 = vector.shape_cast %113 : vector<4xf32> to vector<4x1xf32>
    %cst_36 = arith.constant 3.200000e+01 : f32
    %115 = vector.broadcast %cst_36 : f32 to vector<4x1xf32>
    %116 = arith.divf %114, %115 : vector<4x1xf32>
    %117 = arith.mulf %110, %110 : vector<4x32xf32>
    %cst_37 = arith.constant dense<0.000000e+00> : vector<4xf32>
    %118 = vector.multi_reduction <add>, %117, %cst_37 [1] : vector<4x32xf32> to vector<4xf32>
    %119 = vector.shape_cast %118 : vector<4xf32> to vector<4x1xf32>
    %cst_38 = arith.constant 3.200000e+01 : f32
    %120 = vector.broadcast %cst_38 : f32 to vector<4x1xf32>
    %121 = arith.divf %119, %120 : vector<4x1xf32>
    %122 = vector.broadcast %116 : vector<4x1xf32> to vector<4x32xf32>
    %123 = arith.subf %110, %122 : vector<4x32xf32>
    %124 = arith.mulf %116, %116 : vector<4x1xf32>
    %125 = arith.subf %121, %124 : vector<4x1xf32>
    %cst_39 = arith.constant 9.99999974E-6 : f32
    %126 = vector.broadcast %cst_39 : f32 to vector<4x1xf32>
    %127 = arith.addf %125, %126 : vector<4x1xf32>
    %128 = math.rsqrt %127 : vector<4x1xf32>
    %129 = vector.broadcast %128 : vector<4x1xf32> to vector<4x32xf32>
    %130 = arith.mulf %123, %129 : vector<4x32xf32>
    %131 = vector.broadcast %111 : vector<1x32xf32> to vector<4x32xf32>
    %132 = arith.mulf %130, %131 : vector<4x32xf32>
    %133 = vector.broadcast %112 : vector<1x32xf32> to vector<4x32xf32>
    %134 = arith.addf %132, %133 : vector<4x32xf32>
    %c176 = arith.constant 176 : index
    %c0_40 = arith.constant 0 : index
    %135 = vector.load %arg4[%c176, %c0_40] : memref<608x128xf32, #tpu.memory_space<vmem>>, vector<32x128xf32>
    %cst_41 = arith.constant dense<0.000000e+00> : vector<4x128xf32>
    %136 = tpu.matmul %134, %135, %cst_41 {dimension_numbers = #tpu.dot_dimension_numbers<[1], [0], [0], [1], [0, 0, 1, 1], [], []>} : vector<4x32xf32>, vector<32x128xf32>, vector<4x128xf32> -> vector<4x128xf32>
    %c208 = arith.constant 208 : index
    %c0_42 = arith.constant 0 : index
    %137 = vector.load %arg4[%c208, %c0_42] : memref<608x128xf32, #tpu.memory_space<vmem>>, vector<1x128xf32>
    %138 = vector.broadcast %137 : vector<1x128xf32> to vector<4x128xf32>
    %139 = arith.addf %136, %138 : vector<4x128xf32>
    %140 = arith.mulf %139, %139 : vector<4x128xf32>
    %141 = arith.mulf %139, %140 : vector<4x128xf32>
    %cst_43 = arith.constant 4.471500e-02 : f32
    %142 = vector.broadcast %cst_43 : f32 to vector<4x128xf32>
    %143 = arith.mulf %142, %141 : vector<4x128xf32>
    %144 = arith.addf %139, %143 : vector<4x128xf32>
    %cst_44 = arith.constant 0.797884583 : f32
    %145 = vector.broadcast %cst_44 : f32 to vector<4x128xf32>
    %146 = arith.mulf %145, %144 : vector<4x128xf32>
    %147 = math.tanh %146 : vector<4x128xf32>
    %cst_45 = arith.constant 1.000000e+00 : f32
    %148 = vector.broadcast %cst_45 : f32 to vector<4x128xf32>
    %149 = arith.addf %148, %147 : vector<4x128xf32>
    %cst_46 = arith.constant 5.000000e-01 : f32
    %150 = vector.broadcast %cst_46 : f32 to vector<4x128xf32>
    %151 = arith.mulf %150, %149 : vector<4x128xf32>
    %152 = arith.mulf %139, %151 : vector<4x128xf32>
    %c216 = arith.constant 216 : index
    %c0_47 = arith.constant 0 : index
    %153 = vector.load %arg4[%c216, %c0_47] : memref<608x128xf32, #tpu.memory_space<vmem>>, vector<128x32xf32>
    %cst_48 = arith.constant dense<0.000000e+00> : vector<4x32xf32>
    %154 = tpu.matmul %152, %153, %cst_48 {dimension_numbers = #tpu.dot_dimension_numbers<[1], [0], [0], [1], [0, 0, 1, 1], [], []>} : vector<4x128xf32>, vector<128x32xf32>, vector<4x32xf32> -> vector<4x32xf32>
    %155 = arith.addf %110, %154 : vector<4x32xf32>
    %c344 = arith.constant 344 : index
    %c0_49 = arith.constant 0 : index
    %156 = vector.load %arg4[%c344, %c0_49] : memref<608x128xf32, #tpu.memory_space<vmem>>, vector<1x32xf32>
    %157 = vector.broadcast %156 : vector<1x32xf32> to vector<4x32xf32>
    %158 = arith.addf %155, %157 : vector<4x32xf32>
    %c352 = arith.constant 352 : index
    %c0_50 = arith.constant 0 : index
    %159 = vector.load %arg4[%c352, %c0_50] : memref<608x128xf32, #tpu.memory_space<vmem>>, vector<32x16xf32>
    %cst_51 = arith.constant dense<0.000000e+00> : vector<4x16xf32>
    %160 = tpu.matmul %158, %159, %cst_51 {dimension_numbers = #tpu.dot_dimension_numbers<[1], [0], [0], [1], [0, 0, 1, 1], [], []>} : vector<4x32xf32>, vector<32x16xf32>, vector<4x16xf32> -> vector<4x16xf32>
    %c384 = arith.constant 384 : index
    %c0_52 = arith.constant 0 : index
    %161 = vector.load %arg4[%c384, %c0_52] : memref<608x128xf32, #tpu.memory_space<vmem>>, vector<1x16xf32>
    %162 = vector.broadcast %161 : vector<1x16xf32> to vector<4x16xf32>
    %163 = arith.addf %160, %162 : vector<4x16xf32>
    %164 = tpu.iota {dimensions = array<i32: 0>} : vector<16x4xi32>
    %165 = tpu.iota {dimensions = array<i32: 1>} : vector<16x4xi32>
    %c-1_i32_53 = arith.constant -1 : i32
    %166 = vector.broadcast %c-1_i32_53 : i32 to vector<16x4xi32>
    %c0_i32_54 = arith.constant 0 : i32
    %167 = vector.broadcast %c0_i32_54 : i32 to vector<16x4xi32>
    %168 = arith.cmpi eq, %165, %167 : vector<16x4xi32>
    %169 = arith.index_cast %arg0 : i32 to index
    %c0_55 = arith.constant 0 : index
    %170 = memref.load %arg2[%169, %c0_55] : memref<2x4xi32, #tpu.memory_space<smem>>
    %171 = vector.broadcast %170 : i32 to vector<16x4xi32>
    %172 = arith.select %168, %171, %166 : vector<16x4xi1>, vector<16x4xi32>
    %c1_i32_56 = arith.constant 1 : i32
    %173 = vector.broadcast %c1_i32_56 : i32 to vector<16x4xi32>
    %174 = arith.cmpi eq, %165, %173 : vector<16x4xi32>
    %175 = arith.index_cast %arg0 : i32 to index
    %c1_57 = arith.constant 1 : index
    %176 = memref.load %arg2[%175, %c1_57] : memref<2x4xi32, #tpu.memory_space<smem>>
    %177 = vector.broadcast %176 : i32 to vector<16x4xi32>
    %178 = arith.select %174, %177, %172 : vector<16x4xi1>, vector<16x4xi32>
    %c2_i32_58 = arith.constant 2 : i32
    %179 = vector.broadcast %c2_i32_58 : i32 to vector<16x4xi32>
    %180 = arith.cmpi eq, %165, %179 : vector<16x4xi32>
    %181 = arith.index_cast %arg0 : i32 to index
    %c2_59 = arith.constant 2 : index
    %182 = memref.load %arg2[%181, %c2_59] : memref<2x4xi32, #tpu.memory_space<smem>>
    %183 = vector.broadcast %182 : i32 to vector<16x4xi32>
    %184 = arith.select %180, %183, %178 : vector<16x4xi1>, vector<16x4xi32>
    %c3_i32_60 = arith.constant 3 : i32
    %185 = vector.broadcast %c3_i32_60 : i32 to vector<16x4xi32>
    %186 = arith.cmpi eq, %165, %185 : vector<16x4xi32>
    %187 = arith.index_cast %arg0 : i32 to index
    %c3_61 = arith.constant 3 : index
    %188 = memref.load %arg2[%187, %c3_61] : memref<2x4xi32, #tpu.memory_space<smem>>
    %189 = vector.broadcast %188 : i32 to vector<16x4xi32>
    %190 = arith.select %186, %189, %184 : vector<16x4xi1>, vector<16x4xi32>
    %191 = arith.cmpi eq, %164, %190 : vector<16x4xi32>
    %192 = arith.extui %191 : vector<16x4xi1> to vector<16x4xi32>
    %193 = arith.sitofp %192 : vector<16x4xi32> to vector<16x4xf32>
    %cst_62 = arith.constant dense<0.000000e+00> : vector<16xf32>
    %194 = vector.multi_reduction <add>, %193, %cst_62 [1] : vector<16x4xf32> to vector<16xf32>
    %195 = vector.shape_cast %194 : vector<16xf32> to vector<16x1xf32>
    %cst_63 = arith.constant dense<0.000000e+00> : vector<16x16xf32>
    %196 = tpu.matmul %193, %163, %cst_63 {dimension_numbers = #tpu.dot_dimension_numbers<[1], [0], [0], [1], [0, 0, 1, 1], [], []>} : vector<16x4xf32>, vector<4x16xf32>, vector<16x16xf32> -> vector<16x16xf32>
    %cst_64 = arith.constant 1.000000e+00 : f32
    %197 = vector.broadcast %cst_64 : f32 to vector<16x1xf32>
    %198 = arith.subf %197, %195 : vector<16x1xf32>
    %c392 = arith.constant 392 : index
    %c0_65 = arith.constant 0 : index
    %199 = vector.load %arg4[%c392, %c0_65] : memref<608x128xf32, #tpu.memory_space<vmem>>, vector<1x16xf32>
    %200 = vector.broadcast %198 : vector<16x1xf32> to vector<16x16xf32>
    %201 = vector.broadcast %199 : vector<1x16xf32> to vector<16x16xf32>
    %202 = arith.mulf %200, %201 : vector<16x16xf32>
    %203 = arith.addf %196, %202 : vector<16x16xf32>
    %c400 = arith.constant 400 : index
    %c0_66 = arith.constant 0 : index
    %204 = vector.load %arg4[%c400, %c0_66] : memref<608x128xf32, #tpu.memory_space<vmem>>, vector<16x16xf32>
    %205 = arith.addf %203, %204 : vector<16x16xf32>
    %c416 = arith.constant 416 : index
    %c0_67 = arith.constant 0 : index
    %206 = vector.load %arg4[%c416, %c0_67] : memref<608x128xf32, #tpu.memory_space<vmem>>, vector<1x16xf32>
    %c424 = arith.constant 424 : index
    %c0_68 = arith.constant 0 : index
    %207 = vector.load %arg4[%c424, %c0_68] : memref<608x128xf32, #tpu.memory_space<vmem>>, vector<1x16xf32>
    %cst_69 = arith.constant dense<0.000000e+00> : vector<16xf32>
    %208 = vector.multi_reduction <add>, %205, %cst_69 [1] : vector<16x16xf32> to vector<16xf32>
    %209 = vector.shape_cast %208 : vector<16xf32> to vector<16x1xf32>
    %cst_70 = arith.constant 1.600000e+01 : f32
    %210 = vector.broadcast %cst_70 : f32 to vector<16x1xf32>
    %211 = arith.divf %209, %210 : vector<16x1xf32>
    %212 = arith.mulf %205, %205 : vector<16x16xf32>
    %cst_71 = arith.constant dense<0.000000e+00> : vector<16xf32>
    %213 = vector.multi_reduction <add>, %212, %cst_71 [1] : vector<16x16xf32> to vector<16xf32>
    %214 = vector.shape_cast %213 : vector<16xf32> to vector<16x1xf32>
    %cst_72 = arith.constant 1.600000e+01 : f32
    %215 = vector.broadcast %cst_72 : f32 to vector<16x1xf32>
    %216 = arith.divf %214, %215 : vector<16x1xf32>
    %217 = vector.broadcast %211 : vector<16x1xf32> to vector<16x16xf32>
    %218 = arith.subf %205, %217 : vector<16x16xf32>
    %219 = arith.mulf %211, %211 : vector<16x1xf32>
    %220 = arith.subf %216, %219 : vector<16x1xf32>
    %cst_73 = arith.constant 9.99999974E-6 : f32
    %221 = vector.broadcast %cst_73 : f32 to vector<16x1xf32>
    %222 = arith.addf %220, %221 : vector<16x1xf32>
    %223 = math.rsqrt %222 : vector<16x1xf32>
    %224 = vector.broadcast %223 : vector<16x1xf32> to vector<16x16xf32>
    %225 = arith.mulf %218, %224 : vector<16x16xf32>
    %226 = vector.broadcast %206 : vector<1x16xf32> to vector<16x16xf32>
    %227 = arith.mulf %225, %226 : vector<16x16xf32>
    %228 = vector.broadcast %207 : vector<1x16xf32> to vector<16x16xf32>
    %229 = arith.addf %227, %228 : vector<16x16xf32>
    %c432 = arith.constant 432 : index
    %c0_74 = arith.constant 0 : index
    %230 = vector.load %arg4[%c432, %c0_74] : memref<608x128xf32, #tpu.memory_space<vmem>>, vector<16x48xf32>
    %cst_75 = arith.constant dense<0.000000e+00> : vector<16x48xf32>
    %231 = tpu.matmul %229, %230, %cst_75 {dimension_numbers = #tpu.dot_dimension_numbers<[1], [0], [0], [1], [0, 0, 1, 1], [], []>} : vector<16x16xf32>, vector<16x48xf32>, vector<16x48xf32> -> vector<16x48xf32>
    %cst_76 = arith.constant 0.000000e+00 : f32
    %232 = vector.broadcast %cst_76 : f32 to vector<16x16xf32>
    %233 = vector.extract_strided_slice %231 {offsets = [0, 0], sizes = [16, 8], strides = [1, 1]} : vector<16x48xf32> to vector<16x8xf32>
    %234 = vector.extract_strided_slice %231 {offsets = [0, 16], sizes = [16, 8], strides = [1, 1]} : vector<16x48xf32> to vector<16x8xf32>
    %235 = vector.extract_strided_slice %231 {offsets = [0, 32], sizes = [16, 8], strides = [1, 1]} : vector<16x48xf32> to vector<16x8xf32>
    %cst_77 = arith.constant dense<0.000000e+00> : vector<16x16xf32>
    %236 = tpu.matmul %233, %234, %cst_77 {dimension_numbers = #tpu.dot_dimension_numbers<[1], [1], [0], [0], [0, 0, 1, 0], [], []>} : vector<16x8xf32>, vector<16x8xf32>, vector<16x16xf32> -> vector<16x16xf32>
    %cst_78 = arith.constant 0.353553385 : f32
    %237 = vector.broadcast %cst_78 : f32 to vector<16x16xf32>
    %238 = arith.mulf %236, %237 : vector<16x16xf32>
    %cst_79 = arith.constant dense<0xFF800000> : vector<16xf32>
    %239 = vector.multi_reduction <maximumf>, %238, %cst_79 [1] : vector<16x16xf32> to vector<16xf32>
    %240 = vector.shape_cast %239 : vector<16xf32> to vector<16x1xf32>
    %241 = vector.broadcast %240 : vector<16x1xf32> to vector<16x16xf32>
    %242 = arith.subf %238, %241 : vector<16x16xf32>
    %243 = math.exp %242 : vector<16x16xf32>
    %cst_80 = arith.constant dense<0.000000e+00> : vector<16xf32>
    %244 = vector.multi_reduction <add>, %243, %cst_80 [1] : vector<16x16xf32> to vector<16xf32>
    %245 = vector.shape_cast %244 : vector<16xf32> to vector<16x1xf32>
    %246 = tpu.reciprocal %245 {approx = true} : vector<16x1xf32> -> vector<16x1xf32>
    %247 = vector.broadcast %246 : vector<16x1xf32> to vector<16x16xf32>
    %248 = arith.mulf %243, %247 : vector<16x16xf32>
    %cst_81 = arith.constant dense<0.000000e+00> : vector<16x8xf32>
    %249 = tpu.matmul %248, %235, %cst_81 {dimension_numbers = #tpu.dot_dimension_numbers<[1], [0], [0], [1], [0, 0, 1, 1], [], []>} : vector<16x16xf32>, vector<16x8xf32>, vector<16x8xf32> -> vector<16x8xf32>
    %c448 = arith.constant 448 : index
    %c0_82 = arith.constant 0 : index
    %250 = vector.load %arg4[%c448, %c0_82] : memref<608x128xf32, #tpu.memory_space<vmem>>, vector<8x16xf32>
    %cst_83 = arith.constant dense<0.000000e+00> : vector<16x16xf32>
    %251 = tpu.matmul %249, %250, %cst_83 {dimension_numbers = #tpu.dot_dimension_numbers<[1], [0], [0], [1], [0, 0, 1, 1], [], []>} : vector<16x8xf32>, vector<8x16xf32>, vector<16x16xf32> -> vector<16x16xf32>
    %252 = arith.addf %232, %251 : vector<16x16xf32>
    %253 = vector.extract_strided_slice %231 {offsets = [0, 8], sizes = [16, 8], strides = [1, 1]} : vector<16x48xf32> to vector<16x8xf32>
    %254 = vector.extract_strided_slice %231 {offsets = [0, 24], sizes = [16, 8], strides = [1, 1]} : vector<16x48xf32> to vector<16x8xf32>
    %255 = vector.extract_strided_slice %231 {offsets = [0, 40], sizes = [16, 8], strides = [1, 1]} : vector<16x48xf32> to vector<16x8xf32>
    %cst_84 = arith.constant dense<0.000000e+00> : vector<16x16xf32>
    %256 = tpu.matmul %253, %254, %cst_84 {dimension_numbers = #tpu.dot_dimension_numbers<[1], [1], [0], [0], [0, 0, 1, 0], [], []>} : vector<16x8xf32>, vector<16x8xf32>, vector<16x16xf32> -> vector<16x16xf32>
    %cst_85 = arith.constant 0.353553385 : f32
    %257 = vector.broadcast %cst_85 : f32 to vector<16x16xf32>
    %258 = arith.mulf %256, %257 : vector<16x16xf32>
    %cst_86 = arith.constant dense<0xFF800000> : vector<16xf32>
    %259 = vector.multi_reduction <maximumf>, %258, %cst_86 [1] : vector<16x16xf32> to vector<16xf32>
    %260 = vector.shape_cast %259 : vector<16xf32> to vector<16x1xf32>
    %261 = vector.broadcast %260 : vector<16x1xf32> to vector<16x16xf32>
    %262 = arith.subf %258, %261 : vector<16x16xf32>
    %263 = math.exp %262 : vector<16x16xf32>
    %cst_87 = arith.constant dense<0.000000e+00> : vector<16xf32>
    %264 = vector.multi_reduction <add>, %263, %cst_87 [1] : vector<16x16xf32> to vector<16xf32>
    %265 = vector.shape_cast %264 : vector<16xf32> to vector<16x1xf32>
    %266 = tpu.reciprocal %265 {approx = true} : vector<16x1xf32> -> vector<16x1xf32>
    %267 = vector.broadcast %266 : vector<16x1xf32> to vector<16x16xf32>
    %268 = arith.mulf %263, %267 : vector<16x16xf32>
    %cst_88 = arith.constant dense<0.000000e+00> : vector<16x8xf32>
    %269 = tpu.matmul %268, %255, %cst_88 {dimension_numbers = #tpu.dot_dimension_numbers<[1], [0], [0], [1], [0, 0, 1, 1], [], []>} : vector<16x16xf32>, vector<16x8xf32>, vector<16x8xf32> -> vector<16x8xf32>
    %c456 = arith.constant 456 : index
    %c0_89 = arith.constant 0 : index
    %270 = vector.load %arg4[%c456, %c0_89] : memref<608x128xf32, #tpu.memory_space<vmem>>, vector<8x16xf32>
    %cst_90 = arith.constant dense<0.000000e+00> : vector<16x16xf32>
    %271 = tpu.matmul %269, %270, %cst_90 {dimension_numbers = #tpu.dot_dimension_numbers<[1], [0], [0], [1], [0, 0, 1, 1], [], []>} : vector<16x8xf32>, vector<8x16xf32>, vector<16x16xf32> -> vector<16x16xf32>
    %272 = arith.addf %252, %271 : vector<16x16xf32>
    %273 = arith.addf %205, %272 : vector<16x16xf32>
    %c464 = arith.constant 464 : index
    %c0_91 = arith.constant 0 : index
    %274 = vector.load %arg4[%c464, %c0_91] : memref<608x128xf32, #tpu.memory_space<vmem>>, vector<1x16xf32>
    %275 = vector.broadcast %274 : vector<1x16xf32> to vector<16x16xf32>
    %276 = arith.addf %273, %275 : vector<16x16xf32>
    %c472 = arith.constant 472 : index
    %c0_92 = arith.constant 0 : index
    %277 = vector.load %arg4[%c472, %c0_92] : memref<608x128xf32, #tpu.memory_space<vmem>>, vector<1x16xf32>
    %c480 = arith.constant 480 : index
    %c0_93 = arith.constant 0 : index
    %278 = vector.load %arg4[%c480, %c0_93] : memref<608x128xf32, #tpu.memory_space<vmem>>, vector<1x16xf32>
    %cst_94 = arith.constant dense<0.000000e+00> : vector<16xf32>
    %279 = vector.multi_reduction <add>, %276, %cst_94 [1] : vector<16x16xf32> to vector<16xf32>
    %280 = vector.shape_cast %279 : vector<16xf32> to vector<16x1xf32>
    %cst_95 = arith.constant 1.600000e+01 : f32
    %281 = vector.broadcast %cst_95 : f32 to vector<16x1xf32>
    %282 = arith.divf %280, %281 : vector<16x1xf32>
    %283 = arith.mulf %276, %276 : vector<16x16xf32>
    %cst_96 = arith.constant dense<0.000000e+00> : vector<16xf32>
    %284 = vector.multi_reduction <add>, %283, %cst_96 [1] : vector<16x16xf32> to vector<16xf32>
    %285 = vector.shape_cast %284 : vector<16xf32> to vector<16x1xf32>
    %cst_97 = arith.constant 1.600000e+01 : f32
    %286 = vector.broadcast %cst_97 : f32 to vector<16x1xf32>
    %287 = arith.divf %285, %286 : vector<16x1xf32>
    %288 = vector.broadcast %282 : vector<16x1xf32> to vector<16x16xf32>
    %289 = arith.subf %276, %288 : vector<16x16xf32>
    %290 = arith.mulf %282, %282 : vector<16x1xf32>
    %291 = arith.subf %287, %290 : vector<16x1xf32>
    %cst_98 = arith.constant 9.99999974E-6 : f32
    %292 = vector.broadcast %cst_98 : f32 to vector<16x1xf32>
    %293 = arith.addf %291, %292 : vector<16x1xf32>
    %294 = math.rsqrt %293 : vector<16x1xf32>
    %295 = vector.broadcast %294 : vector<16x1xf32> to vector<16x16xf32>
    %296 = arith.mulf %289, %295 : vector<16x16xf32>
    %297 = vector.broadcast %277 : vector<1x16xf32> to vector<16x16xf32>
    %298 = arith.mulf %296, %297 : vector<16x16xf32>
    %299 = vector.broadcast %278 : vector<1x16xf32> to vector<16x16xf32>
    %300 = arith.addf %298, %299 : vector<16x16xf32>
    %c488 = arith.constant 488 : index
    %c0_99 = arith.constant 0 : index
    %301 = vector.load %arg4[%c488, %c0_99] : memref<608x128xf32, #tpu.memory_space<vmem>>, vector<16x64xf32>
    %cst_100 = arith.constant dense<0.000000e+00> : vector<16x64xf32>
    %302 = tpu.matmul %300, %301, %cst_100 {dimension_numbers = #tpu.dot_dimension_numbers<[1], [0], [0], [1], [0, 0, 1, 1], [], []>} : vector<16x16xf32>, vector<16x64xf32>, vector<16x64xf32> -> vector<16x64xf32>
    %c504 = arith.constant 504 : index
    %c0_101 = arith.constant 0 : index
    %303 = vector.load %arg4[%c504, %c0_101] : memref<608x128xf32, #tpu.memory_space<vmem>>, vector<1x64xf32>
    %304 = vector.broadcast %303 : vector<1x64xf32> to vector<16x64xf32>
    %305 = arith.addf %302, %304 : vector<16x64xf32>
    %306 = arith.mulf %305, %305 : vector<16x64xf32>
    %307 = arith.mulf %305, %306 : vector<16x64xf32>
    %cst_102 = arith.constant 4.471500e-02 : f32
    %308 = vector.broadcast %cst_102 : f32 to vector<16x64xf32>
    %309 = arith.mulf %308, %307 : vector<16x64xf32>
    %310 = arith.addf %305, %309 : vector<16x64xf32>
    %cst_103 = arith.constant 0.797884583 : f32
    %311 = vector.broadcast %cst_103 : f32 to vector<16x64xf32>
    %312 = arith.mulf %311, %310 : vector<16x64xf32>
    %313 = math.tanh %312 : vector<16x64xf32>
    %cst_104 = arith.constant 1.000000e+00 : f32
    %314 = vector.broadcast %cst_104 : f32 to vector<16x64xf32>
    %315 = arith.addf %314, %313 : vector<16x64xf32>
    %cst_105 = arith.constant 5.000000e-01 : f32
    %316 = vector.broadcast %cst_105 : f32 to vector<16x64xf32>
    %317 = arith.mulf %316, %315 : vector<16x64xf32>
    %318 = arith.mulf %305, %317 : vector<16x64xf32>
    %c512 = arith.constant 512 : index
    %c0_106 = arith.constant 0 : index
    %319 = vector.load %arg4[%c512, %c0_106] : memref<608x128xf32, #tpu.memory_space<vmem>>, vector<64x16xf32>
    %cst_107 = arith.constant dense<0.000000e+00> : vector<16x16xf32>
    %320 = tpu.matmul %318, %319, %cst_107 {dimension_numbers = #tpu.dot_dimension_numbers<[1], [0], [0], [1], [0, 0, 1, 1], [], []>} : vector<16x64xf32>, vector<64x16xf32>, vector<16x16xf32> -> vector<16x16xf32>
    %321 = arith.addf %276, %320 : vector<16x16xf32>
    %c576 = arith.constant 576 : index
    %c0_108 = arith.constant 0 : index
    %322 = vector.load %arg4[%c576, %c0_108] : memref<608x128xf32, #tpu.memory_space<vmem>>, vector<1x16xf32>
    %323 = vector.broadcast %322 : vector<1x16xf32> to vector<16x16xf32>
    %324 = arith.addf %321, %323 : vector<16x16xf32>
    %325 = tpu.iota {dimensions = array<i32: 0>} : vector<12x16xi32>
    %326 = tpu.iota {dimensions = array<i32: 1>} : vector<12x16xi32>
    %c-1_i32_109 = arith.constant -1 : i32
    %327 = vector.broadcast %c-1_i32_109 : i32 to vector<12x16xi32>
    %c0_i32_110 = arith.constant 0 : i32
    %328 = vector.broadcast %c0_i32_110 : i32 to vector<12x16xi32>
    %329 = arith.cmpi eq, %325, %328 : vector<12x16xi32>
    %330 = arith.index_cast %arg0 : i32 to index
    %c0_111 = arith.constant 0 : index
    %331 = memref.load %arg1[%330, %c0_111] : memref<2x12xi32, #tpu.memory_space<smem>>
    %332 = vector.broadcast %331 : i32 to vector<12x16xi32>
    %333 = arith.select %329, %332, %327 : vector<12x16xi1>, vector<12x16xi32>
    %c1_i32_112 = arith.constant 1 : i32
    %334 = vector.broadcast %c1_i32_112 : i32 to vector<12x16xi32>
    %335 = arith.cmpi eq, %325, %334 : vector<12x16xi32>
    %336 = arith.index_cast %arg0 : i32 to index
    %c1_113 = arith.constant 1 : index
    %337 = memref.load %arg1[%336, %c1_113] : memref<2x12xi32, #tpu.memory_space<smem>>
    %338 = vector.broadcast %337 : i32 to vector<12x16xi32>
    %339 = arith.select %335, %338, %333 : vector<12x16xi1>, vector<12x16xi32>
    %c2_i32_114 = arith.constant 2 : i32
    %340 = vector.broadcast %c2_i32_114 : i32 to vector<12x16xi32>
    %341 = arith.cmpi eq, %325, %340 : vector<12x16xi32>
    %342 = arith.index_cast %arg0 : i32 to index
    %c2_115 = arith.constant 2 : index
    %343 = memref.load %arg1[%342, %c2_115] : memref<2x12xi32, #tpu.memory_space<smem>>
    %344 = vector.broadcast %343 : i32 to vector<12x16xi32>
    %345 = arith.select %341, %344, %339 : vector<12x16xi1>, vector<12x16xi32>
    %c3_i32_116 = arith.constant 3 : i32
    %346 = vector.broadcast %c3_i32_116 : i32 to vector<12x16xi32>
    %347 = arith.cmpi eq, %325, %346 : vector<12x16xi32>
    %348 = arith.index_cast %arg0 : i32 to index
    %c3_117 = arith.constant 3 : index
    %349 = memref.load %arg1[%348, %c3_117] : memref<2x12xi32, #tpu.memory_space<smem>>
    %350 = vector.broadcast %349 : i32 to vector<12x16xi32>
    %351 = arith.select %347, %350, %345 : vector<12x16xi1>, vector<12x16xi32>
    %c4_i32 = arith.constant 4 : i32
    %352 = vector.broadcast %c4_i32 : i32 to vector<12x16xi32>
    %353 = arith.cmpi eq, %325, %352 : vector<12x16xi32>
    %354 = arith.index_cast %arg0 : i32 to index
    %c4 = arith.constant 4 : index
    %355 = memref.load %arg1[%354, %c4] : memref<2x12xi32, #tpu.memory_space<smem>>
    %356 = vector.broadcast %355 : i32 to vector<12x16xi32>
    %357 = arith.select %353, %356, %351 : vector<12x16xi1>, vector<12x16xi32>
    %c5_i32 = arith.constant 5 : i32
    %358 = vector.broadcast %c5_i32 : i32 to vector<12x16xi32>
    %359 = arith.cmpi eq, %325, %358 : vector<12x16xi32>
    %360 = arith.index_cast %arg0 : i32 to index
    %c5 = arith.constant 5 : index
    %361 = memref.load %arg1[%360, %c5] : memref<2x12xi32, #tpu.memory_space<smem>>
    %362 = vector.broadcast %361 : i32 to vector<12x16xi32>
    %363 = arith.select %359, %362, %357 : vector<12x16xi1>, vector<12x16xi32>
    %c6_i32 = arith.constant 6 : i32
    %364 = vector.broadcast %c6_i32 : i32 to vector<12x16xi32>
    %365 = arith.cmpi eq, %325, %364 : vector<12x16xi32>
    %366 = arith.index_cast %arg0 : i32 to index
    %c6 = arith.constant 6 : index
    %367 = memref.load %arg1[%366, %c6] : memref<2x12xi32, #tpu.memory_space<smem>>
    %368 = vector.broadcast %367 : i32 to vector<12x16xi32>
    %369 = arith.select %365, %368, %363 : vector<12x16xi1>, vector<12x16xi32>
    %c7_i32 = arith.constant 7 : i32
    %370 = vector.broadcast %c7_i32 : i32 to vector<12x16xi32>
    %371 = arith.cmpi eq, %325, %370 : vector<12x16xi32>
    %372 = arith.index_cast %arg0 : i32 to index
    %c7 = arith.constant 7 : index
    %373 = memref.load %arg1[%372, %c7] : memref<2x12xi32, #tpu.memory_space<smem>>
    %374 = vector.broadcast %373 : i32 to vector<12x16xi32>
    %375 = arith.select %371, %374, %369 : vector<12x16xi1>, vector<12x16xi32>
    %c8_i32 = arith.constant 8 : i32
    %376 = vector.broadcast %c8_i32 : i32 to vector<12x16xi32>
    %377 = arith.cmpi eq, %325, %376 : vector<12x16xi32>
    %378 = arith.index_cast %arg0 : i32 to index
    %c8 = arith.constant 8 : index
    %379 = memref.load %arg1[%378, %c8] : memref<2x12xi32, #tpu.memory_space<smem>>
    %380 = vector.broadcast %379 : i32 to vector<12x16xi32>
    %381 = arith.select %377, %380, %375 : vector<12x16xi1>, vector<12x16xi32>
    %c9_i32 = arith.constant 9 : i32
    %382 = vector.broadcast %c9_i32 : i32 to vector<12x16xi32>
    %383 = arith.cmpi eq, %325, %382 : vector<12x16xi32>
    %384 = arith.index_cast %arg0 : i32 to index
    %c9 = arith.constant 9 : index
    %385 = memref.load %arg1[%384, %c9] : memref<2x12xi32, #tpu.memory_space<smem>>
    %386 = vector.broadcast %385 : i32 to vector<12x16xi32>
    %387 = arith.select %383, %386, %381 : vector<12x16xi1>, vector<12x16xi32>
    %c10_i32 = arith.constant 10 : i32
    %388 = vector.broadcast %c10_i32 : i32 to vector<12x16xi32>
    %389 = arith.cmpi eq, %325, %388 : vector<12x16xi32>
    %390 = arith.index_cast %arg0 : i32 to index
    %c10 = arith.constant 10 : index
    %391 = memref.load %arg1[%390, %c10] : memref<2x12xi32, #tpu.memory_space<smem>>
    %392 = vector.broadcast %391 : i32 to vector<12x16xi32>
    %393 = arith.select %389, %392, %387 : vector<12x16xi1>, vector<12x16xi32>
    %c11_i32 = arith.constant 11 : i32
    %394 = vector.broadcast %c11_i32 : i32 to vector<12x16xi32>
    %395 = arith.cmpi eq, %325, %394 : vector<12x16xi32>
    %396 = arith.index_cast %arg0 : i32 to index
    %c11 = arith.constant 11 : index
    %397 = memref.load %arg1[%396, %c11] : memref<2x12xi32, #tpu.memory_space<smem>>
    %398 = vector.broadcast %397 : i32 to vector<12x16xi32>
    %399 = arith.select %395, %398, %393 : vector<12x16xi1>, vector<12x16xi32>
    %400 = arith.cmpi eq, %326, %399 : vector<12x16xi32>
    %401 = arith.extui %400 : vector<12x16xi1> to vector<12x16xi32>
    %402 = arith.sitofp %401 : vector<12x16xi32> to vector<12x16xf32>
    %cst_118 = arith.constant dense<0.000000e+00> : vector<12x16xf32>
    %403 = tpu.matmul %402, %324, %cst_118 {dimension_numbers = #tpu.dot_dimension_numbers<[1], [0], [0], [1], [0, 0, 1, 1], [], []>} : vector<12x16xf32>, vector<16x16xf32>, vector<12x16xf32> -> vector<12x16xf32>
    %c584 = arith.constant 584 : index
    %c0_119 = arith.constant 0 : index
    %404 = vector.load %arg4[%c584, %c0_119] : memref<608x128xf32, #tpu.memory_space<vmem>>, vector<16x48xf32>
    %cst_120 = arith.constant dense<0.000000e+00> : vector<12x48xf32>
    %405 = tpu.matmul %403, %404, %cst_120 {dimension_numbers = #tpu.dot_dimension_numbers<[1], [0], [0], [1], [0, 0, 1, 1], [], []>} : vector<12x16xf32>, vector<16x48xf32>, vector<12x48xf32> -> vector<12x48xf32>
    %c600 = arith.constant 600 : index
    %c0_121 = arith.constant 0 : index
    %406 = vector.load %arg4[%c600, %c0_121] : memref<608x128xf32, #tpu.memory_space<vmem>>, vector<1x48xf32>
    %407 = vector.broadcast %406 : vector<1x48xf32> to vector<12x48xf32>
    %408 = arith.addf %405, %407 : vector<12x48xf32>
    %cst_122 = arith.constant dense<0.000000e+00> : vector<12x48xf32>
    %409 = tpu.matmul %402, %1, %cst_122 {dimension_numbers = #tpu.dot_dimension_numbers<[1], [0], [0], [1], [0, 0, 1, 1], [], []>} : vector<12x16xf32>, vector<16x48xf32>, vector<12x48xf32> -> vector<12x48xf32>
    %410 = arith.subf %408, %409 : vector<12x48xf32>
    %411 = arith.mulf %410, %410 : vector<12x48xf32>
    %412 = vector.shape_cast %411 : vector<12x48xf32> to vector<1x12x48xf32>
    %cst_123 = arith.constant dense<0.000000e+00> : vector<1xf32>
    %413 = vector.multi_reduction <add>, %412, %cst_123 [1, 2] : vector<1x12x48xf32> to vector<1xf32>
    %414 = vector.shape_cast %413 : vector<1xf32> to vector<1x1x1xf32>
    %415 = vector.extract %414[0, 0, 0] : f32 from vector<1x1x1xf32>
    %416 = vector.broadcast %415 : f32 to vector<1x1xf32>
    %cst_124 = arith.constant 8.68055562E-4 : f32
    %417 = vector.broadcast %cst_124 : f32 to vector<1x1xf32>
    %418 = arith.mulf %416, %417 : vector<1x1xf32>
    %c0_125 = arith.constant 0 : index
    %c0_126 = arith.constant 0 : index
    %c0_127 = arith.constant 0 : index
    %419 = vector.load %arg5[%c0_125, %c0_126, %c0_127] : memref<1x1x1xf32, #tpu.memory_space<vmem>>, vector<1x1x1xf32>
    %420 = vector.shape_cast %419 : vector<1x1x1xf32> to vector<1x1xf32>
    %421 = vector.shape_cast %418 : vector<1x1xf32> to vector<1x1x1xf32>
    tpu.vector_store %arg5[%c0_125, %c0_126, %c0_127], %421 {strides = array<i32>} : memref<1x1x1xf32, #tpu.memory_space<vmem>>, vector<1x1x1xf32>,
    return
  }
  func.func @transform_0(%arg0: i32, %arg1: memref<2x12xi32, #tpu.memory_space<smem>>, %arg2: memref<2x4xi32, #tpu.memory_space<smem>>) -> (i32, i32, i32) {
    %c0_i32 = arith.constant 0 : i32
    %c0_i32_0 = arith.constant 0 : i32
    %c0_i32_1 = arith.constant 0 : i32
    return %arg0, %c0_i32, %c0_i32_0 : i32, i32, i32
  }
  func.func @transform_1(%arg0: i32, %arg1: memref<2x12xi32, #tpu.memory_space<smem>>, %arg2: memref<2x4xi32, #tpu.memory_space<smem>>) -> (i32, i32) {
    %c0_i32 = arith.constant 0 : i32
    %c0_i32_0 = arith.constant 0 : i32
    %c0_i32_1 = arith.constant 0 : i32
    return %c0_i32, %c0_i32_0 : i32, i32
  }
  func.func @transform_2(%arg0: i32, %arg1: memref<2x12xi32, #tpu.memory_space<smem>>, %arg2: memref<2x4xi32, #tpu.memory_space<smem>>) -> (i32, i32, i32) {
    %c0_i32 = arith.constant 0 : i32
    %c0_i32_0 = arith.constant 0 : i32
    %c0_i32_1 = arith.constant 0 : i32
    return %arg0, %c0_i32, %c0_i32_0 : i32, i32, i32
  }
}

</mosaic_0001>

<bundles_post_ra>
// kernel: forward.1
= control target key start
LH: loop header
LB: loop body
LE: loop exit
PB: predicated region body
PF: predicated region fallthrough
CT: control target
= control target key end

     0   :  { %s1645_s21 = smov [#allocation3]   ;;  %s1646_s22 = smov [#allocation4]   ;;  %s2170_s0 = inlined_call_operand.vmem [shape: s32[2,12], index: 0, kind: input, shape index: {}]   ;;  %s2171_s2 = inlined_call_operand.vmem [shape: f32[2,16,48], index: 2, kind: input, shape index: {}]   ;;  %s2172_s3 = inlined_call_operand.vmem [shape: f32[608,128], index: 3, kind: input, shape index: {}]   ;;  %s2173_s4 = inlined_call_operand.vmem [shape: f32[2,1,1], index: 4, kind: output, shape index: {}]   ;;  %s2174_s1 = inlined_call_operand.vmem [shape: s32[2,4], index: 1, kind: input, shape index: {}]  }
   0x1   :  { %s10_s17 = sshll.u32 %s2170_s0, 4  ;;  %s15_s20 = sshll.u32 %s2174_s1, 4  ;;  %s11_s17 = int_to_ptr.vmem [resolvable:$true] %s10_s17  ;;  %s16_s20 = int_to_ptr.vmem [resolvable:$true] %s15_s20 }
   0x2   :  { %13 = dma.vmem_to_smem %s11_s17, 32, %s1645_s21, [#allocation2] }
   0x3   :  { %18 = dma.vmem_to_smem %s16_s20, 32, %s1646_s22, [#allocation2] }
   0x4   :  { %1639 = dma.done.wait [#allocation2], 64 }
   0x5   :  { %1640 = vsyncadd [#allocation2], 4294967232 }
   0x6   :  { %21 = sfence }
   0x7   :  { %s1689_s23 = smov 0  }
   0x8 LB: > { %s1447_s0 = sadd.s32 4294967295, %s1643_s23   ;;  %p1451_p0 = scmp.ge.s32.totalorder %s1643_s23, 1  ;;  %s1643_s23 = sphi %s1689_s23, %s27_s23  }
   0x9   : > { %p127_p1 = scmp.lt.s32.totalorder %s1643_s23, 3 }
   0xb   : > { %p128_p2 = pnand %p1451_p0, %p127_p1 }
   0xc   : > { %p147_p3 = scmp.lt.s32.totalorder (!%p128_p2), %s1447_s0, 1  ;;  %s1727_s14 = sshll.u32 (!%p128_p2), %s1447_s0, 7 }
   0xd   : > { %131 = sbr.rel (%p128_p2) target bundleno = 4065 (0xfe1), region = 28  ;;  %s209_s15 = sadd.s32 (!%p128_p2), 1, %s1727_s14 }
   0xe   : > { %s1213_s16 = sld [smem:[#allocation3 + %s1727_s14]] (!%p128_p2)  ;;  %s214_s17 = sadd.s32 (!%p128_p2), 2, %s1727_s14 }
   0xf   : > { %s1218_s18 = sld [smem:[#allocation3 + %s209_s15]] (!%p128_p2)  ;;  %s219_s19 = sadd.s32 (!%p128_p2), 3, %s1727_s14 }
  0x10   : > { %s1223_s20 = sld [smem:[#allocation3 + %s214_s17]] (!%p128_p2)  ;;  %s1651_s25 = smov (!%p128_p2), 80  }
  0x11   : > { %s1228_s21 = sld [smem:[#allocation3 + %s219_s19]] (!%p128_p2)  ;;  %s1652_s26 = smov (!%p128_p2), 48  }
  0x12   : > { %v162_v0 = vld [vmem:[%s2172_s3 + $0x28] sm:$0xff]  ;;  %v161_v1 = vld [vmem:[%s2172_s3 + $0x20] sm:$0xff]  ;;  %v160_v2 = vld [vmem:[%s2172_s3 + $0x18] sm:$0xff]  ;;  %s1706_s29 = scalar_select %p147_p3, %s1447_s0, 1  ;;  %vm165_vm0 = vcmask 392192   ;;  %v199_v8 = vlaneseq  ;;  %v1647_v36 = vmov 0.0  }
  0x13   : > { %182 = vmatpush.msra.mxu0 %v162_v0  ;;  %v159_v3 = vld [vmem:[%s2172_s3 + $0x10] sm:$0xff]  ;;  %v158_v4 = vld [vmem:[%s2172_s3 + $0x8] sm:$0xff]  ;;  %v157_v5 = vld [vmem:[%s2172_s3] sm:$0xff]  ;;  %s1743_s22 = sld [smem:[#allocation4 + %s1727_s14]]  ;;  %vm226_vm6 = vcmask 130048   ;;  %vm252_vm7 = vcmask 257024  }
  0x14   : > { %s1509_s6 = sshll.u32 %s1706_s29, 4  ;;  %v1733_v9 = vshrl.u32 %v199_v8, 7  ;;  %v1214_v10 = vstv %s1213_s16  ;;  %s1750_s0 = sld [smem:[#allocation4 + %s209_s15]]  ;;  %v1545_v26 = vld [vmem:[%s2172_s3 + $0x30] ss:$0 sm:$0xff]  ;;  %v1773_v27 = vand.u32 127, %v199_v8 }
  0x15   : > { %183 = vmatpush.msra.mxu0 %v161_v1  ;;  %s1721_s13 = scalar_lea.vmem %s2171_s2, %s1509_s6  ;;  %v1219_v11 = vstv %s1218_s18  ;;  %s1752_s1 = sld [smem:[#allocation4 + %s214_s17]]  ;;  %v196_v30 = vld [vmem:[%s2172_s3 + $0x40] sm:$0xff]  ;;  %v195_v33 = vld [vmem:[%s2172_s3 + $0x38] sm:$0xff]  ;;  %v1648_v42 = vmov 32.0   ;;  %v291_v48 = vld [vmem:[%s2172_s3 + $0x70] sm:$0xff]  ;;  %vm292_vm12 = vcmask 261120  }
  0x16   : > { %v155_v6 = vld [vmem:[%s1721_s13] sm:$0xff]  ;;  %v156_v7 = vld [vmem:[%s1721_s13 + $0x8] sm:$0xff]  ;;  %vm203_vm1 = vcmp.eq.s32.totalorder %v1733_v9, 0  ;;  %v1224_v12 = vstv %s1223_s20  ;;  %vm208_vm2 = vcmp.eq.s32.totalorder %v1733_v9, 1  ;;  %vm213_vm3 = vcmp.eq.s32.totalorder %v1733_v9, 2  ;;  %s1755_s24 = sld [smem:[#allocation4 + %s219_s19]]  ;;  %308 = vmatpush.msra.mxu2 %v291_v48 }
  0x17   : > { %184 = vmatpush.msra.mxu0 %v160_v2  ;;  %v1215_v13 = vsel %vm203_vm1, %v1214_v10, 4294967295  ;;  %v1229_v14 = vstv %s1228_s21  ;;  %vm218_vm4 = vcmp.eq.s32.totalorder %v1733_v9, 3  ;;  %1563 = vrcp.f32 %v1648_v42  ;;  %v290_v49 = vld [vmem:[%s2172_s3 + $0x68] sm:$0xff]  ;;  %v289_v51 = vld [vmem:[%s2172_s3 + $0x60] sm:$0xff]  ;;  %v288_v53 = vld [vmem:[%s2172_s3 + $0x58] sm:$0xff]  ;;  %s1649_s20 = smov 112  }
  0x18   : > { %v1220_v15 = vsel %vm208_vm2, %v1219_v11, %v1215_v13  ;;  %309 = vmatpush.msra.mxu2 %v290_v49  ;;  %s1650_s21 = smov 96   ;;  %vm344_vm13 = vcmask 27648   ;;  %vm362_vm14 = vcmask 1043456   ;;  %s1653_s27 = smov 64   ;;  %vm358_vm15 = vcmask 31744   ;;  %v386_v48 = vld [vmem:[%s2172_s3 + $0x80] sm:$0xff] }
  0x19   : > { %185 = vmatpush.msra.mxu0 %v159_v3  ;;  %v1225_v16 = vsel %vm213_vm3, %v1224_v12, %v1220_v15  ;;  %v206_v18 = vstv %s1743_s22  ;;  %v1546_v3 = vld [vmem:[%s2172_s3 + $0x48] ss:$0 sm:$0xff]  ;;  %v385_v49 = vld [vmem:[%s2172_s3 + $0x78] sm:$0xff]  ;;  %s1655_s9 = smov 104   ;;  %s1656_s10 = smov 120  }
  0x1a   : > { %v1748_v17 = vsel %vm218_vm4, %v1229_v14, %v1225_v16  ;;  %v207_v19 = vsel %vm203_vm1, %v206_v18, 4294967295  ;;  %v211_v20 = vstv %s1750_s0  ;;  %310 = vmatpush.msra.mxu2 %v289_v51  ;;  %s1241_s17 = sadd.s32 5, %s1727_s14  ;;  %s1255_s18 = sadd.s32 7, %s1727_s14 }
  0x1b   : > { %186 = vmatpush.msra.mxu0 %v158_v4  ;;  %v212_v22 = vsel %vm208_vm2, %v211_v20, %v207_v19  ;;  %v216_v23 = vstv %s1752_s1  ;;  %s1234_s1 = sadd.s32 4, %s1727_s14  ;;  %s1242_s19 = sld [smem:[#allocation3 + %s1241_s17]] }
  0x1c   : > { %v217_v24 = vsel %vm213_vm3, %v216_v23, %v212_v22  ;;  %v221_v25 = vstv %s1755_s24  ;;  %311 = vmatpush.msra.mxu2 %v288_v53  ;;  %s1235_s24 = sld [smem:[#allocation3 + %s1234_s1]]  ;;  %s1269_s28 = sadd.s32 9, %s1727_s14 }
  0x1d   : > { %187 = vmatpush.msra.mxu0 %v157_v5  ;;  %v222_v28 = vsel %vm218_vm4, %v221_v25, %v217_v24  ;;  %v1564_v43 = vpop.eup %1563  ;;  %vm644_vm4 = vcmp.eq.s32.totalorder %v1773_v27, 0  ;;  %s1276_s30 = sadd.s32 10, %s1727_s14  ;;  %s1283_s6 = sadd.s32 11, %s1727_s14 }
  0x1e   : > { %1454 = vmatmul.msk.f32.vlgmr.msra.gmra.mxu0 %vm165_vm0, %v155_v6  ;;  %vm223_vm5 = vcmp.eq.s32.totalorder %v1773_v27, %v222_v28  ;;  %v257_v44 = vmul.f32 32.0, %v1564_v43  ;;  %vm261_vm8 = vweird.f32 %v1564_v43  ;;  %v1547_v6 = vld [vmem:[%s2172_s3 + $0x50] ss:$0 sm:$0xff]  ;;  %s1270_s7 = sld [smem:[#allocation3 + %s1269_s28]] }
  0x1f   : > { %v1457_v37 = vsel %vm223_vm5, 1.0, %v1647_v36  ;;  %vm646_vm5 = vcmp.eq.s32.totalorder %v1773_v27, 1  ;;  %s1277_s8 = sld [smem:[#allocation3 + %s1276_s30]] }
  0x20   : > { %v258_v45 = vsub.f32 1.0, %v257_v44 }
  0x22   : > { %v259_v46 = vmul.f32 %v1564_v43, %v258_v45 }
  0x24   : > { %v260_v47 = vadd.f32 %v1564_v43, %v259_v46  ;;  %v455_v46 = vld [vmem:[%s2172_s3 + $0x90] sm:$0xff] }
  0x26   : > { %1455 = vmatmul.msk.f32.gmra.mxu0 %vm165_vm0, %v156_v7  ;;  %v1804_v52 = vsel %vm261_vm8, %v1564_v43, %v260_v47  ;;  %v454_v47 = vld [vmem:[%s2172_s3 + $0x88] sm:$0xff]  ;;  %vm650_vm8 = vcmp.eq.s32.totalorder %v1773_v27, 3 }
  0x9b   : > { %v189_v21 = vpop.f32.mrf.mxu0 }
  0x9c   : > { %v190_v31 = vadd.f32 %v1545_v26, %v189_v21 }
  0x9e   : > { %v197_v35 = vadd.f32 %v195_v33, %v190_v31 }
  0xa3   : > { %v192_v29 = vpop.f32.mrf.mxu0 }
  0xa4   : > { %v193_v32 = vadd.f32 %v1545_v26, %v192_v29 }
  0xa6   : > { %v198_v34 = vadd.f32 %v196_v30, %v193_v32 }
  0xa8   : > { %244 = vmatpush.msra.mxu1 %v198_v34 }
  0xaa   : > { %245 = vmatpush.msra.mxu1 %v197_v35 }
  0xab   : > { %1458 = vmatmul.msk.f32.vlgmr.msra.gmra.mxu1 %vm226_vm6, %v1457_v37 }
 0x128   : > { %v1788_v38 = vpop.f32.mrf.mxu1 }
 0x129   : > { %v253_v39 = vsel %vm252_vm7, %v1788_v38, 0.0  ;;  %v264_v40 = vmul.f32 %v1788_v38, %v1788_v38 }
 0x12a   : > { %254 = vadd.xlane.f32.xlu0 %v253_v39 }
 0x12b   : > { %v265_v41 = vsel %vm252_vm7, %v264_v40, 0.0 }
 0x132   : > { %266 = vadd.xlane.f32.xlu0 %v265_v41 }
 0x19d   : > { %v255_v50 = vpop.xlane.xlu0 %254 }
 0x19e   : > { %v263_v54 = vmul.f32 %v1804_v52, %v255_v50 }
 0x1a0   : > { %v270_v56 = vmul.f32 %v263_v54, %v263_v54  ;;  %v269_v2 = vsub.f32 %v1788_v38, %v263_v54 }
 0x1a5   : > { %v267_v55 = vpop.xlane.xlu0 %266 }
 0x1a6   : > { %v268_v57 = vmul.f32 %v267_v55, %v1804_v52 }
 0x1a8   : > { %v271_v58 = vsub.f32 %v268_v57, %v270_v56  ;;  %v1548_v56 = vld [vmem:[%s2172_s3 + $0x98] ss:$0 sm:$0xff] }
 0x1aa   : > { %v272_v59 = vadd.f32 1e-05, %v271_v58 }
 0x1ac   : > { %1565 = vrsqrt.f32 %v272_v59  ;;  %vm279_vm10 = vweird.f32 %v272_v59 }
 0x1b2   : > { %v1566_v60 = vpop.eup %1565 }
 0x1b3   : > { %v274_v61 = vmul.f32 %v1566_v60, %v272_v59  ;;  %vm280_vm9 = vweird.f32 %v1566_v60 }
 0x1b4   : > { %vm281_vm11 = vmor %vm279_vm10, %vm280_vm9 }
 0x1b5   : > { %v275_v62 = vmul.f32 %v1566_v60, %v274_v61 }
 0x1b7   : > { %v276_v63 = vmul.f32 0.5, %v275_v62  ;;  %v539_v62 = vld [vmem:[%s2172_s3 + $0xc8] sm:$0xff] }
 0x1b9   : > { %v277_v0 = vsub.f32 1.5, %v276_v63  ;;  %v537_v63 = vld [vmem:[%s2172_s3 + $0xb8] sm:$0xff] }
 0x1bb   : > { %v278_v1 = vmul.f32 %v1566_v60, %v277_v0  ;;  %v536_v0 = vld [vmem:[%s2172_s3 + $0xb0] sm:$0xff] }
 0x1bd   : > { %v282_v4 = vsel %vm281_vm11, %v1566_v60, %v278_v1 }
 0x1be   : > { %v283_v5 = vmul.f32 %v282_v4, %v269_v2  ;;  %v588_v4 = vld [vmem:[%s2172_s3 + $0x148] sm:$0xff] }
 0x1c0   : > { %v285_v7 = vmul.f32 %v1546_v3, %v283_v5  ;;  %v589_v3 = vld [vmem:[%s2172_s3 + $0x150] sm:$0xff] }
 0x1c1   : > { %590 = vmatpush.msrb.mxu0 %v589_v3 }
 0x1c2   : > { %v287_v8 = vadd.f32 %v1547_v6, %v285_v7 }
 0x1c3   : > { %591 = vmatpush.msrb.mxu0 %v588_v4 }
 0x1c4   : > { %1459 = vmatmul.msk.f32.vlgmr.msra.gmra.mxu2 %vm292_vm12, %v287_v8  ;;  %v587_v8 = vld [vmem:[%s2172_s3 + $0x140] sm:$0xff] }
 0x1c5   : > { %592 = vmatpush.msrb.mxu0 %v587_v8 }
 0x247   : > { %v313_v10 = vpop.f32.mrf.mxu2 }
 0x248   : > { %387 = vrot.lane.b32.xlu2 %v313_v10, %s1649_s20  ;;  %317 = vrot.lane.b32.xlu1 %v313_v10, %s1650_s21 }
 0x250   : > { %389 = vrot.lane.b32.xlu1 %v313_v10, %s1651_s25 }
 0x2a2   : > { %v388_v13 = vpop.permute.xlu2 %387 }
 0x2ba   : > { %v318_v11 = vpop.permute.xlu1 %317 }
 0x2bb   : > { %1460 = vmatpush.xpose.msk.msra.mxu3 %vm226_vm6, %v318_v11 }
 0x2be   : > { %1461 = vmatmul.msk.f32.vlgmr.msra.gmra.mxu3 %vm226_vm6, %v313_v10 }
 0x2c2   : > { %v390_v12 = vpop.permute.xlu1 %389 }
 0x2c3   : > { %1464 = vmatpush.xpose.msk.msrb.mxu3 %vm226_vm6, %v390_v12 }
 0x2c6   : > { %1465 = vmatmul.msk.f32.vlgmr.msrb.gmra.mxu3 %vm226_vm6, %v388_v13 }
 0x2c7   : > { %496 = vmatpush.msra.mxu3 %v386_v48 }
 0x2c9   : > { %497 = vmatpush.msra.mxu3 %v385_v49 }
 0x341   : > { %v340_v14 = vpop.f32.mrf.mxu3 }
 0x342   : > { %v343_v15 = vmul.f32 0.25, %v340_v14 }
 0x344   : > { %v345_v16 = vsel %vm344_vm13, %v343_v15, -inf }
 0x345   : > { %346 = vmax.xlane.f32.xlu2 %v345_v16 }
 0x349   : > { %v412_v19 = vpop.f32.mrf.mxu3 }
 0x34a   : > { %v415_v21 = vmul.f32 0.25, %v412_v19 }
 0x34c   : > { %v416_v22 = vsel %vm344_vm13, %v415_v21, -inf }
 0x34d   : > { %417 = vmax.xlane.f32.xlu0 %v416_v22 }
 0x35d   : > { %427 = vrot.lane.b32.xlu2 %v313_v10, %s1652_s26  ;;  %s1256_s26 = sld [smem:[#allocation3 + %s1255_s18]] }
 0x3b8   : > { %v347_v24 = vpop.xlane.xlu2 %346 }
 0x3b9   : > { %v348_v26 = vsub.f32 %v343_v15, %v347_v24 }
 0x3bb   : > { %v349_v28 = vmul.f32 1.442695, %v348_v26  ;;  %v1550_v26 = vld [vmem:[%s2172_s3 + $0xa8] ss:$0 sm:$0xff] }
 0x3bd   : > { %1567 = vpow2.f32 %v349_v28 }
 0x3c0   : > { %v428_v29 = vpop.permute.xlu2 %427  ;;  %v418_v30 = vpop.xlane.xlu0 %417 }
 0x3c1   : > { %v419_v31 = vsub.f32 %v415_v21, %v418_v30  ;;  %1466 = vmatpush.msk.msrb.mxu2 %vm362_vm14, %v428_v29  ;;  %v586_v30 = vld [vmem:[%s2172_s3 + $0x138] sm:$0xff] }
 0x3c2   : > { %593 = vmatpush.msrb.mxu0 %v586_v30 }
 0x3c3   : > { %v1568_v32 = vpop.eup %1567  ;;  %v420_v33 = vmul.f32 1.442695, %v419_v31  ;;  %557 = vmatpush.msra.mxu2 %v539_v62  ;;  %v585_v31 = vld [vmem:[%s2172_s3 + $0x130] sm:$0xff]  ;;  %v614_v62 = vld [vmem:[%s2172_s3 + $0x160] sm:$0xff] }
 0x3c4   : > { %v351_v34 = vsel %vm344_vm13, %v1568_v32, 0.0  ;;  %594 = vmatpush.msrb.mxu0 %v585_v31 }
 0x3c5   : > { %1569 = vpow2.f32 %v420_v33  ;;  %352 = vadd.xlane.f32.xlu1 %v351_v34  ;;  %v583_v33 = vld [vmem:[%s2172_s3 + $0x120] sm:$0xff]  ;;  %v582_v34 = vld [vmem:[%s2172_s3 + $0x118] sm:$0xff] }
 0x3cb   : > { %v1570_v35 = vpop.eup %1569 }
 0x3cc   : > { %v422_v37 = vsel %vm344_vm13, %v1570_v35, 0.0 }
 0x3cd   : > { %423 = vadd.xlane.f32.xlu0 %v422_v37  ;;  %v580_v37 = vld [vmem:[%s2172_s3 + $0x108] sm:$0xff] }
 0x3e1   : > { %356 = vrot.lane.b32.xlu0 %v313_v10, %s1653_s27  ;;  %s1262_s27 = sadd.s32 8, %s1727_s14 }
 0x3e2   : > { %s1263_s5 = sld [smem:[#allocation3 + %s1262_s27]] }
 0x438   : > { %v353_v41 = vpop.xlane.xlu1 %352 }
 0x440   : > { %v424_v39 = vpop.xlane.xlu0 %423 }
 0x441   : > { %1571 = vrcp.f32 %v424_v39  ;;  %v579_v39 = vld [vmem:[%s2172_s3 + $0x100] sm:$0xff] }
 0x442   : > { %1573 = vrcp.f32 %v353_v41  ;;  %v577_v41 = vld [vmem:[%s2172_s3 + $0xf0] sm:$0xff] }
 0x447   : > { %v1572_v40 = vpop.eup %1571 }
 0x448   : > { %v426_v42 = vmul.f32 %v1572_v40, %v1570_v35  ;;  %v1574_v43 = vpop.eup %1573  ;;  %v581_v35 = vld [vmem:[%s2172_s3 + $0x110] sm:$0xff]  ;;  %v578_v40 = vld [vmem:[%s2172_s3 + $0xf8] sm:$0xff] }
 0x449   : > { %v355_v45 = vmul.f32 %v1574_v43, %v1568_v32  ;;  %v584_v32 = vld [vmem:[%s2172_s3 + $0x128] sm:$0xff]  ;;  %v575_v43 = vld [vmem:[%s2172_s3 + $0xe0] sm:$0xff] }
 0x44a   : > { %1467 = vmatmul.msk.f32.vlgmr.msrb.gmra.mxu2 %vm358_vm15, %v426_v42  ;;  %595 = vmatpush.msrb.mxu0 %v584_v32  ;;  %v576_v42 = vld [vmem:[%s2172_s3 + $0xe8] sm:$0xff] }
 0x44c   : > { %596 = vmatpush.msrb.mxu0 %v583_v33 }
 0x44e   : > { %597 = vmatpush.msrb.mxu0 %v582_v34 }
 0x450   : > { %598 = vmatpush.msrb.mxu0 %v581_v35 }
 0x452   : > { %599 = vmatpush.msrb.mxu0 %v580_v37  ;;  %v1654_v37 = vmov 16.0  }
 0x453   : > { %v357_v44 = vpop.permute.xlu0 %356 }
 0x454   : > { %1462 = vmatpush.msk.msrb.mxu1 %vm362_vm14, %v357_v44  ;;  %600 = vmatpush.msrb.mxu0 %v579_v39  ;;  %v574_v44 = vld [vmem:[%s2172_s3 + $0xd8] sm:$0xff] }
 0x455   : > { %1463 = vmatmul.msk.f32.vlgmr.msrb.gmra.mxu1 %vm358_vm15, %v355_v45  ;;  %v617_v45 = vld [vmem:[%s2172_s3 + $0x178] sm:$0xff] }
 0x456   : > { %473 = vmatpush.msra.mxu1 %v455_v46  ;;  %601 = vmatpush.msrb.mxu0 %v578_v40  ;;  %v1551_v46 = vld [vmem:[%s2172_s3 + $0xd0] ss:$0 sm:$0xff] }
 0x458   : > { %474 = vmatpush.msra.mxu1 %v454_v47  ;;  %602 = vmatpush.msrb.mxu0 %v577_v41 }
 0x45a   : > { %603 = vmatpush.msrb.mxu0 %v576_v42  ;;  %635 = vmatpush.msrb.mxu1 %v617_v45  ;;  %v770_v45 = vld [vmem:[%s2172_s3 + $0x1b8] sm:$0xff] }
 0x45c   : > { %604 = vmatpush.msrb.mxu0 %v575_v43 }
 0x45e   : > { %605 = vmatpush.msrb.mxu0 %v574_v44 }
 0x460   : > { %791 = vmatpush.msra.mxu0 %v770_v45 }
 0x4cd   : > { %v451_v50 = vpop.f32.mrf.mxu2 }
 0x4ce   : > { %1468 = vmatmul.msk.f32.vlgmr.msra.gmra.mxu1 %vm226_vm6, %v451_v50 }
 0x4d2   : > { %v382_v51 = vpop.f32.mrf.mxu1 }
 0x4d3   : > { %1469 = vmatmul.msk.f32.vlgmr.msra.gmra.mxu3 %vm226_vm6, %v382_v51 }
 0x54b   : > { %v476_v53 = vpop.f32.mrf.mxu1 }
 0x556   : > { %v499_v54 = vpop.f32.mrf.mxu3 }
 0x557   : > { %v500_v55 = vadd.f32 %v499_v54, %v476_v53 }
 0x559   : > { %v502_v57 = vadd.f32 %v500_v55, %v1788_v38  ;;  %v538_v38 = vld [vmem:[%s2172_s3 + $0xc0] sm:$0xff] }
 0x55a   : > { %558 = vmatpush.msra.mxu2 %v538_v38  ;;  %v1552_v38 = vld [vmem:[%s2172_s3 + $0x158] ss:$0 sm:$0xff] }
 0x55b   : > { %v1851_v58 = vadd.f32 %v1548_v56, %v502_v57 }
 0x55c   : > { %559 = vmatpush.msra.mxu2 %v537_v63 }
 0x55d   : > { %v508_v59 = vsel %vm252_vm7, %v1851_v58, 0.0  ;;  %v512_v60 = vmul.f32 %v1851_v58, %v1851_v58 }
 0x55e   : > { %509 = vadd.xlane.f32.xlu0 %v508_v59  ;;  %560 = vmatpush.msra.mxu2 %v536_v0 }
 0x55f   : > { %v513_v61 = vsel %vm252_vm7, %v512_v60, 0.0  ;;  %v616_v60 = vld [vmem:[%s2172_s3 + $0x170] sm:$0xff]  ;;  %vm648_vm7 = vcmp.eq.s32.totalorder %v1773_v27, 2 }
 0x560   : > { %514 = vadd.xlane.f32.xlu1 %v513_v61  ;;  %636 = vmatpush.msrb.mxu1 %v616_v60  ;;  %v615_v61 = vld [vmem:[%s2172_s3 + $0x168] sm:$0xff] }
 0x561   : > { %1510 = vmatpush.msrb.mxu2 %v770_v45 }
 0x562   : > { %637 = vmatpush.msrb.mxu1 %v615_v61 }
 0x564   : > { %638 = vmatpush.msrb.mxu1 %v614_v62 }
 0x5d1   : > { %v510_v1 = vpop.xlane.xlu0 %509 }
 0x5d2   : > { %v511_v2 = vmul.f32 %v510_v1, %v1804_v52 }
 0x5d3   : > { %v515_v5 = vpop.xlane.xlu1 %514 }
 0x5d4   : > { %v518_v6 = vmul.f32 %v511_v2, %v511_v2  ;;  %v516_v7 = vmul.f32 %v515_v5, %v1804_v52  ;;  %v517_v21 = vsub.f32 %v1851_v58, %v511_v2  ;;  %v1549_v52 = vld [vmem:[%s2172_s3 + $0xa0] ss:$0 sm:$0xff]  ;;  %v645_v2 = vsel %vm644_vm4, %v206_v18, 4294967295 }
 0x5d5   : > { %v647_v3 = vsel %vm646_vm5, %v211_v20, %v645_v2  ;;  %v1959_v5 = vadd.s32 8, %v1733_v9 }
 0x5d6   : > { %v519_v10 = vsub.f32 %v516_v7, %v518_v6  ;;  %v649_v4 = vsel %vm648_vm7, %v216_v23, %v647_v3  ;;  %v1553_v23 = vld [vmem:[%s2172_s3 + $0x180] ss:$0 sm:$0xff] }
 0x5d8   : > { %v520_v11 = vadd.f32 1e-05, %v519_v10 }
 0x5da   : > { %1575 = vrsqrt.f32 %v520_v11  ;;  %vm527_vm2 = vweird.f32 %v520_v11 }
 0x5e0   : > { %v1576_v12 = vpop.eup %1575 }
 0x5e1   : > { %v522_v13 = vmul.f32 %v1576_v12, %v520_v11  ;;  %vm528_vm1 = vweird.f32 %v1576_v12 }
 0x5e2   : > { %vm529_vm3 = vmor %vm527_vm2, %vm528_vm1 }
 0x5e3   : > { %v523_v14 = vmul.f32 %v1576_v12, %v522_v13 }
 0x5e5   : > { %v524_v15 = vmul.f32 0.5, %v523_v14 }
 0x5e7   : > { %v525_v16 = vsub.f32 1.5, %v524_v15 }
 0x5e9   : > { %v526_v19 = vmul.f32 %v1576_v12, %v525_v16  ;;  %v702_v16 = vld [vmem:[%s2172_s3 + $0x190] sm:$0xff] }
 0x5eb   : > { %v530_v22 = vsel %vm529_vm3, %v1576_v12, %v526_v19  ;;  %v1554_v12 = vld [vmem:[%s2172_s3 + $0x188] ss:$0 sm:$0xff]  ;;  %vm806_vm3 = vcmask 64512  }
 0x5ec   : > { %v531_v24 = vmul.f32 %v530_v22, %v517_v21 }
 0x5ee   : > { %v533_v28 = vmul.f32 %v1549_v52, %v531_v24 }
 0x5f0   : > { %v535_v29 = vadd.f32 %v1550_v26, %v533_v28 }
 0x5f2   : > { %1470 = vmatmul.msk.f32.vlgmr.msra.gmra.mxu2 %vm292_vm12, %v535_v29  ;;  %v703_v29 = vld [vmem:[%s2172_s3 + $0x198] sm:$0xff] }
 0x675   : > { %v562_v47 = vpop.f32.mrf.mxu2 }
 0x676   : > { %v563_v48 = vadd.f32 %v1551_v46, %v562_v47 }
 0x678   : > { %v565_v49 = vmul.f32 %v563_v48, %v563_v48 }
 0x67a   : > { %v566_v50 = vmul.f32 %v565_v49, %v563_v48 }
 0x67c   : > { %v567_v51 = vmul.f32 0.044715, %v566_v50 }
 0x67e   : > { %v568_v53 = vadd.f32 %v567_v51, %v563_v48 }
 0x680   : > { %v569_v54 = vmul.f32 0.7978846, %v568_v53 }
 0x682   : > { %1577 = vtanh.f32 %v569_v54 }
 0x683   : > { %1579 = vrcp.f32 %v1654_v37 }
 0x688   : > { %v1578_v55 = vpop.eup %1577 }
 0x689   : > { %v571_v56 = vadd.f32 1.0, %v1578_v55  ;;  %v1580_v39 = vpop.eup %1579 }
 0x68a   : > { %v715_v40 = vmul.f32 16.0, %v1580_v39  ;;  %vm719_vm11 = vweird.f32 %v1580_v39 }
 0x68b   : > { %v572_v57 = vmul.f32 0.5, %v571_v56 }
 0x68c   : > { %v716_v41 = vsub.f32 1.0, %v715_v40 }
 0x68d   : > { %v573_v59 = vmul.f32 %v572_v57, %v563_v48  ;;  %v769_v48 = vld [vmem:[%s2172_s3 + $0x1b0] sm:$0xff] }
 0x68e   : > { %v717_v42 = vmul.f32 %v1580_v39, %v716_v41  ;;  %1511 = vmatpush.msrb.mxu2 %v769_v48  ;;  %792 = vmatpush.msra.mxu0 %v769_v48 }
 0x68f   : > { %606 = vmatmul.f32.vlgmr.msrb.gmra.mxu0 %v573_v59 }
 0x690   : > { %v718_v43 = vadd.f32 %v1580_v39, %v717_v42 }
 0x692   : > { %v2001_v46 = vsel %vm719_vm11, %v1580_v39, %v718_v43  ;;  %vm1176_vm11 = vcmask 523264  }
 0x70c   : > { %v607_v63 = vpop.f32.mrf.mxu0 }
 0x70d   : > { %v610_v0 = vadd.f32 %v607_v63, %v1851_v58  ;;  %v651_v58 = vsel %vm650_vm8, %v221_v25, %v649_v4 }
 0x70e   : > { %vm652_vm9 = vcmp.eq.s32.totalorder %v1733_v9, %v651_v58  ;;  %vm653_vm10 = vcmp.eq.s32.totalorder %v1959_v5, %v651_v58 }
 0x70f   : > { %v613_v1 = vadd.f32 %v1552_v38, %v610_v0  ;;  %v1472_v18 = vsel %vm652_vm9, 1.0, %v1647_v36  ;;  %v1473_v6 = vsel %vm653_vm10, 1.0, %v1647_v36 }
 0x710   : > { %v658_v20 = vsel %vm358_vm15, %v1472_v18, 0.0  ;;  %v661_v7 = vsel %vm358_vm15, %v1473_v6, 0.0 }
 0x711   : > { %1471 = vmatmul.msk.f32.vlgmr.msrb.gmra.mxu1 %vm292_vm12, %v613_v1  ;;  %659 = vadd.xlane.f32.xlu2 %v658_v20 }
 0x712   : > { %662 = vadd.xlane.f32.xlu1 %v661_v7 }
 0x784   : > { %v660_v10 = vpop.xlane.xlu2 %659 }
 0x785   : > { %v664_v11 = vsub.f32 1.0, %v660_v10  ;;  %v663_v14 = vpop.xlane.xlu1 %662 }
 0x786   : > { %v665_v21 = vsub.f32 1.0, %v663_v14 }
 0x787   : > { %v668_v13 = vmul.f32 %v1554_v12, %v664_v11 }
 0x788   : > { %v669_v22 = vmul.f32 %v1554_v12, %v665_v21 }
 0x78e   : > { %v640_v8 = vpop.f32.mrf.mxu1 }
 0x78f   : > { %v641_v25 = vadd.f32 %v1553_v23, %v640_v8  ;;  %v1556_v23 = vld [vmem:[%s2172_s3 + $0x1a8] ss:$0 sm:$0xff] }
 0x791   : > { %1474 = vmatpush.msk.msrb.mxu3 %vm362_vm14, %v641_v25 }
 0x792   : > { %1475 = vmatmul.msk.f32.vlgmr.msrb.gmra.mxu3 %vm358_vm15, %v1472_v18  ;;  %v1555_v18 = vld [vmem:[%s2172_s3 + $0x1a0] ss:$0 sm:$0xff] }
 0x79a   : > { %1476 = vmatmul.msk.f32.gmra.mxu3 %vm358_vm15, %v1473_v6 }
 0x815   : > { %v696_v15 = vpop.f32.mrf.mxu3 }
 0x816   : > { %v697_v19 = vadd.f32 %v696_v15, %v668_v13 }
 0x818   : > { %v1981_v52 = vadd.f32 %v702_v16, %v697_v19 }
 0x81a   : > { %v723_v24 = vmul.f32 %v1981_v52, %v1981_v52  ;;  %v708_v35 = vsel %vm226_vm6, %v1981_v52, 0.0 }
 0x81c   : > { %v725_v26 = vsel %vm226_vm6, %v723_v24, 0.0 }
 0x81d   : > { %v699_v28 = vpop.f32.mrf.mxu3  ;;  %726 = vadd.xlane.f32.xlu0 %v725_v26 }
 0x81e   : > { %v700_v30 = vadd.f32 %v699_v28, %v669_v22 }
 0x820   : > { %v1989_v31 = vadd.f32 %v703_v29, %v700_v30 }
 0x822   : > { %v711_v32 = vsel %vm226_vm6, %v1989_v31, 0.0  ;;  %v724_v33 = vmul.f32 %v1989_v31, %v1989_v31 }
 0x823   : > { %712 = vadd.xlane.f32.xlu1 %v711_v32 }
 0x824   : > { %v728_v34 = vsel %vm226_vm6, %v724_v33, 0.0 }
 0x82b   : > { %729 = vadd.xlane.f32.xlu1 %v728_v34 }
 0x833   : > { %709 = vadd.xlane.f32.xlu1 %v708_v35 }
 0x890   : > { %v727_v55 = vpop.xlane.xlu0 %726 }
 0x891   : > { %v731_v59 = vmul.f32 %v727_v55, %v2001_v46 }
 0x896   : > { %v713_v44 = vpop.xlane.xlu1 %712 }
 0x897   : > { %v722_v47 = vmul.f32 %v2001_v46, %v713_v44 }
 0x899   : > { %v736_v50 = vmul.f32 %v722_v47, %v722_v47  ;;  %v734_v58 = vsub.f32 %v1989_v31, %v722_v47 }
 0x89e   : > { %v730_v49 = vpop.xlane.xlu1 %729 }
 0x89f   : > { %v732_v51 = vmul.f32 %v730_v49, %v2001_v46 }
 0x8a1   : > { %v738_v53 = vsub.f32 %v732_v51, %v736_v50 }
 0x8a3   : > { %v740_v54 = vadd.f32 1e-05, %v738_v53 }
 0x8a5   : > { %1581 = vrsqrt.f32 %v740_v54  ;;  %vm757_vm13 = vweird.f32 %v740_v54 }
 0x8a6   : > { %v710_v56 = vpop.xlane.xlu1 %709 }
 0x8a7   : > { %v721_v57 = vmul.f32 %v2001_v46, %v710_v56 }
 0x8a9   : > { %v735_v60 = vmul.f32 %v721_v57, %v721_v57  ;;  %v733_v14 = vsub.f32 %v1981_v52, %v721_v57 }
 0x8ab   : > { %v1582_v61 = vpop.eup %1581  ;;  %v737_v62 = vsub.f32 %v731_v59, %v735_v60 }
 0x8ac   : > { %v752_v38 = vmul.f32 %v1582_v61, %v740_v54  ;;  %vm758_vm12 = vweird.f32 %v1582_v61 }
 0x8ad   : > { %v739_v63 = vadd.f32 1e-05, %v737_v62  ;;  %vm759_vm14 = vmor %vm757_vm13, %vm758_vm12  ;;  %vm1232_vm12 = vcmp.eq.s32.totalorder %v1733_v9, 4  ;;  %vm1239_vm13 = vcmp.eq.s32.totalorder %v1733_v9, 5 }
 0x8ae   : > { %v753_v0 = vmul.f32 %v1582_v61, %v752_v38 }
 0x8af   : > { %1583 = vrsqrt.f32 %v739_v63  ;;  %vm747_vm1 = vweird.f32 %v739_v63 }
 0x8b0   : > { %v754_v1 = vmul.f32 0.5, %v753_v0 }
 0x8b2   : > { %v755_v2 = vsub.f32 1.5, %v754_v1 }
 0x8b4   : > { %v756_v3 = vmul.f32 %v1582_v61, %v755_v2 }
 0x8b5   : > { %v1584_v4 = vpop.eup %1583 }
 0x8b6   : > { %v760_v6 = vsel %vm759_vm14, %v1582_v61, %v756_v3  ;;  %v742_v20 = vmul.f32 %v1584_v4, %v739_v63  ;;  %vm748_vm15 = vweird.f32 %v1584_v4  ;;  %vm1246_vm14 = vcmp.eq.s32.totalorder %v1733_v9, 6 }
 0x8b7   : > { %v762_v7 = vmul.f32 %v760_v6, %v734_v58  ;;  %vm749_vm2 = vmor %vm747_vm1, %vm748_vm15  ;;  %vm1253_vm15 = vcmp.eq.s32.totalorder %v1733_v9, 7 }
 0x8b8   : > { %v743_v8 = vmul.f32 %v1584_v4, %v742_v20 }
 0x8b9   : > { %v765_v25 = vmul.f32 %v1555_v18, %v762_v7 }
 0x8ba   : > { %v744_v10 = vmul.f32 0.5, %v743_v8 }
 0x8bb   : > { %v768_v11 = vadd.f32 %v1556_v23, %v765_v25 }
 0x8bc   : > { %v745_v12 = vsub.f32 1.5, %v744_v10 }
 0x8bd   : > { %1478 = vmatmul.msk.f32.vlgmr.msrb.gmra.mxu2 %vm226_vm6, %v768_v11 }
 0x8be   : > { %v746_v13 = vmul.f32 %v1584_v4, %v745_v12 }
 0x8c0   : > { %v750_v15 = vsel %vm749_vm2, %v1584_v4, %v746_v13  ;;  %vm1261_vm2 = vcmp.eq.s32.totalorder %v1959_v5, 8 }
 0x8c1   : > { %v761_v16 = vmul.f32 %v750_v15, %v733_v14 }
 0x8c3   : > { %v764_v19 = vmul.f32 %v1555_v18, %v761_v16 }
 0x8c5   : > { %v767_v21 = vadd.f32 %v1556_v23, %v764_v19 }
 0x8c7   : > { %1477 = vmatmul.msk.f32.vlgmr.msra.gmra.mxu0 %vm226_vm6, %v767_v21 }
 0x940   : > { %v797_v22 = vpop.f32.mrf.mxu2 }
 0x941   : > { %904 = vrot.lane.b32.xlu2 %v797_v22, %s1655_s9  ;;  %804 = vrot.lane.b32.xlu1 %v797_v22, %s1649_s20 }
 0x944   : > { %v794_v24 = vpop.f32.mrf.mxu0 }
 0x945   : > { %802 = vrot.lane.b32.xlu0 %v794_v24, %s1649_s20  ;;  %v1535_v49 = vpack.i.bf16 %v794_v24, %v797_v22  ;;  %s1657_s20 = smov 88  }
 0x949   : > { %898 = vrot.lane.b32.xlu1 %v794_v24, %s1656_s10 }
 0x94d   : > { %902 = vrot.lane.b32.xlu0 %v794_v24, %s1655_s9  ;;  %s1284_s9 = sld [smem:[#allocation3 + %s1283_s6]] }
 0x955   : > { %900 = vrot.lane.b32.xlu0 %v797_v22, %s1656_s10 }
 0x99b   : > { %v905_v26 = vpop.permute.xlu2 %904 }
 0x99c   : > { %1485 = vmatpush.xpose.msk.msra.mxu2 %vm806_vm3, %v905_v26 }
 0x9b3   : > { %v805_v28 = vpop.permute.xlu1 %804 }
 0x9b4   : > { %1479 = vmatpush.xpose.msk.msra.mxu1 %vm806_vm3, %v805_v28  ;;  %v897_v28 = vld [vmem:[%s2172_s3 + $0x1c0] sm:$0xff] }
 0x9b7   : > { %v803_v29 = vpop.permute.xlu0 %802 }
 0x9b8   : > { %1480 = vmatpush.xpose.msk.msra.mxu1 %vm806_vm3, %v803_v29  ;;  %v996_v29 = vld [vmem:[%s2172_s3 + $0x1c8] sm:$0xff] }
 0x9bb   : > { %1481 = vmatmul.msk.f32.vlgmr.msra.gmra.mxu1 %vm806_vm3, %v794_v24  ;;  %v899_v32 = vpop.permute.xlu1 %898 }
 0x9bc   : > { %1018 = vmatpush.msrb.mxu1 %v996_v29 }
 0x9bf   : > { %v903_v30 = vpop.permute.xlu0 %902 }
 0x9c0   : > { %1486 = vmatpush.xpose.msk.msra.mxu2 %vm806_vm3, %v903_v30 }
 0x9c3   : > { %1482 = vmatmul.msk.f32.gmra.mxu1 %vm806_vm3, %v797_v22  ;;  %1487 = vmatmul.msk.f32.vlgmr.msra.gmra.mxu2 %vm806_vm3, %v899_v32 }
 0x9c7   : > { %v901_v33 = vpop.permute.xlu0 %900 }
 0x9cb   : > { %1488 = vmatmul.msk.f32.gmra.mxu2 %vm806_vm3, %v901_v33 }
 0xa38   : > { %v832_v34 = vpop.f32.mrf.mxu1 }
 0xa39   : > { %v838_v35 = vmul.f32 0.35355338, %v832_v34 }
 0xa3b   : > { %v840_v37 = vsel %vm226_vm6, %v838_v35, -inf }
 0xa3c   : > { %841 = vmax.xlane.f32.xlu1 %v840_v37 }
 0xa40   : > { %v835_v39 = vpop.f32.mrf.mxu1 }
 0xa41   : > { %v839_v40 = vmul.f32 0.35355338, %v835_v39 }
 0xa43   : > { %v843_v41 = vsel %vm226_vm6, %v839_v40, -inf }
 0xa44   : > { %844 = vmax.xlane.f32.xlu0 %v843_v41 }
 0xa46   : > { %v931_v42 = vpop.f32.mrf.mxu2 }
 0xa47   : > { %v937_v43 = vmul.f32 0.35355338, %v931_v42 }
 0xa49   : > { %v939_v44 = vsel %vm226_vm6, %v937_v43, -inf }
 0xa4a   : > { %940 = vmax.xlane.f32.xlu2 %v939_v44 }
 0xa4e   : > { %v934_v45 = vpop.f32.mrf.mxu2 }
 0xa4f   : > { %v938_v47 = vmul.f32 0.35355338, %v934_v45 }
 0xa51   : > { %v942_v48 = vsel %vm226_vm6, %v938_v47, -inf }
 0xa52   : > { %943 = vmax.xlane.f32.xlu1 %v942_v48 }
 0xa58   : > { %1536 = vrot.lane.b32.xlu0 %v1535_v49, %s1650_s21 }
 0xaaf   : > { %v842_v50 = vpop.xlane.xlu1 %841 }
 0xab0   : > { %v846_v51 = vsub.f32 %v838_v35, %v842_v50 }
 0xab2   : > { %v848_v53 = vmul.f32 1.442695, %v846_v51 }
 0xab4   : > { %1585 = vpow2.f32 %v848_v53 }
 0xab7   : > { %v845_v54 = vpop.xlane.xlu0 %844 }
 0xab8   : > { %v847_v55 = vsub.f32 %v839_v40, %v845_v54  ;;  %v1557_v40 = vld [vmem:[%s2172_s3 + $0x1d0] ss:$0 sm:$0xff] }
 0xaba   : > { %v1586_v56 = vpop.eup %1585  ;;  %v850_v57 = vmul.f32 1.442695, %v847_v55  ;;  %v1118_v55 = vld [vmem:[%s2172_s3 + $0x1f0] sm:$0xff] }
 0xabb   : > { %v852_v59 = vsel %vm226_vm6, %v1586_v56, 0.0  ;;  %1141 = vmatpush.msrb.mxu2 %v1118_v55 }
 0xabc   : > { %1587 = vpow2.f32 %v850_v57  ;;  %853 = vadd.xlane.f32.xlu2 %v852_v59  ;;  %v1609_v59 = vld [vmem:[%s1721_s13 + $0x8] sm:$0xff] }
 0xabd   : > { %v941_v60 = vpop.xlane.xlu2 %940 }
 0xabe   : > { %v945_v61 = vsub.f32 %v937_v43, %v941_v60 }
 0xac0   : > { %v947_v62 = vmul.f32 1.442695, %v945_v61 }
 0xac2   : > { %v1588_v38 = vpop.eup %1587  ;;  %1589 = vpow2.f32 %v947_v62 }
 0xac3   : > { %v855_v63 = vsel %vm226_vm6, %v1588_v38, 0.0 }
 0xac4   : > { %856 = vadd.xlane.f32.xlu1 %v855_v63 }
 0xac5   : > { %v944_v0 = vpop.xlane.xlu1 %943 }
 0xac6   : > { %v946_v1 = vsub.f32 %v938_v47, %v944_v0 }
 0xac8   : > { %v1590_v2 = vpop.eup %1589  ;;  %v949_v3 = vmul.f32 1.442695, %v946_v1 }
 0xac9   : > { %v951_v4 = vsel %vm226_vm6, %v1590_v2, 0.0 }
 0xaca   : > { %1591 = vpow2.f32 %v949_v3  ;;  %v1537_v58 = vpop.permute.xlu0 %1536  ;;  %952 = vadd.xlane.f32.xlu2 %v951_v4 }
 0xacb   : > { %v1538_v18 = vunpack.i.l.bf16 %v1537_v58  ;;  %v1539_v6 = vunpack.i.h.bf16 %v1537_v58 }
 0xacd   : > { %888 = vmatpush.msra.mxu3 %v1538_v18 }
 0xacf   : > { %889 = vmatpush.msra.mxu3 %v1539_v6 }
 0xad0   : > { %v1592_v20 = vpop.eup %1591 }
 0xad1   : > { %v954_v7 = vsel %vm226_vm6, %v1592_v20, 0.0  ;;  %1047 = vmatpush.msrb.mxu3 %v897_v28 }
 0xad2   : > { %955 = vadd.xlane.f32.xlu2 %v954_v7 }
 0xadd   : > { %1541 = vrot.lane.b32.xlu1 %v1535_v49, %s1657_s20 }
 0xb2f   : > { %v854_v23 = vpop.xlane.xlu2 %853 }
 0xb30   : > { %1593 = vrcp.f32 %v854_v23 }
 0xb36   : > { %v1594_v8 = vpop.eup %1593 }
 0xb37   : > { %v860_v25 = vmul.f32 %v1594_v8, %v1586_v56  ;;  %v857_v10 = vpop.xlane.xlu1 %856 }
 0xb38   : > { %1595 = vrcp.f32 %v857_v10 }
 0xb39   : > { %1483 = vmatmul.msk.f32.vlgmr.msra.gmra.mxu3 %vm226_vm6, %v860_v25 }
 0xb3d   : > { %v953_v13 = vpop.xlane.xlu2 %952 }
 0xb3e   : > { %v1596_v11 = vpop.eup %1595  ;;  %1597 = vrcp.f32 %v953_v13  ;;  %v1558_v13 = vld [vmem:[%s2172_s3 + $0x1d8] ss:$0 sm:$0xff] }
 0xb3f   : > { %v861_v12 = vmul.f32 %v1596_v11, %v1588_v38  ;;  %v1610_v38 = vld [vmem:[%s1721_s13] sm:$0xff]  ;;  %s1248_s13 = sadd.s32 6, %s1727_s14 }
 0xb40   : > { %s1249_s25 = sld [smem:[#allocation3 + %s1248_s13]] }
 0xb41   : > { %1484 = vmatmul.msk.f32.gmra.mxu3 %vm226_vm6, %v861_v12 }
 0xb44   : > { %v1598_v16 = vpop.eup %1597 }
 0xb45   : > { %v956_v14 = vpop.xlane.xlu2 %955  ;;  %v959_v22 = vmul.f32 %v1598_v16, %v1590_v2  ;;  %v1559_v16 = vld [vmem:[%s2172_s3 + $0x1e0] ss:$0 sm:$0xff] }
 0xb46   : > { %1599 = vrcp.f32 %v956_v14 }
 0xb4c   : > { %v1600_v24 = vpop.eup %1599 }
 0xb4d   : > { %v960_v26 = vmul.f32 %v1600_v24, %v1592_v20 }
 0xb4f   : > { %v1542_v15 = vpop.permute.xlu1 %1541 }
 0xb50   : > { %v1543_v19 = vunpack.i.l.bf16 %v1542_v15  ;;  %v1544_v21 = vunpack.i.h.bf16 %v1542_v15 }
 0xb52   : > { %987 = vmatpush.msrb.mxu0 %v1543_v19 }
 0xb54   : > { %988 = vmatpush.msrb.mxu0 %v1544_v21 }
 0xb55   : > { %1489 = vmatmul.msk.f32.vlgmr.msrb.gmra.mxu0 %vm226_vm6, %v959_v22 }
 0xb5d   : > { %1490 = vmatmul.msk.f32.gmra.mxu0 %vm226_vm6, %v960_v26 }
 0xbbc   : > { %v891_v30 = vpop.f32.mrf.mxu3 }
 0xbbd   : > { %1493 = vmatmul.msk.f32.vlgmr.msrb.gmra.mxu3 %vm806_vm3, %v891_v30 }
 0xbc4   : > { %v894_v32 = vpop.f32.mrf.mxu3 }
 0xbc5   : > { %1494 = vmatmul.msk.f32.gmra.mxu3 %vm806_vm3, %v894_v32 }
 0xbd2   : > { %v990_v33 = vpop.f32.mrf.mxu0 }
 0xbd3   : > { %1491 = vmatmul.msk.f32.vlgmr.msrb.gmra.mxu1 %vm806_vm3, %v990_v33 }
 0xbda   : > { %v993_v34 = vpop.f32.mrf.mxu0 }
 0xbdb   : > { %1492 = vmatmul.msk.f32.gmra.mxu1 %vm806_vm3, %v993_v34  ;;  %vm1268_vm3 = vcmp.eq.s32.totalorder %v1959_v5, 9 }
 0xc40   : > { %v1049_v35 = vpop.f32.mrf.mxu3 }
 0xc48   : > { %v1052_v45 = vpop.f32.mrf.mxu3 }
 0xc50   : > { %v1020_v37 = vpop.f32.mrf.mxu1 }
 0xc51   : > { %v1050_v39 = vadd.f32 %v1049_v35, %v1020_v37  ;;  %v1175_v35 = vld [vmem:[%s2172_s3 + $0x238] sm:$0xff]  ;;  %v1174_v37 = vld [vmem:[%s2172_s3 + $0x230] sm:$0xff] }
 0xc52   : > { %1191 = vmatpush.msra.mxu0 %v1175_v35 }
 0xc53   : > { %v1055_v41 = vadd.f32 %v1050_v39, %v1981_v52  ;;  %v1173_v39 = vld [vmem:[%s2172_s3 + $0x228] sm:$0xff] }
 0xc54   : > { %1192 = vmatpush.msra.mxu0 %v1174_v37 }
 0xc55   : > { %v2057_v42 = vadd.f32 %v1557_v40, %v1055_v41  ;;  %v1171_v41 = vld [vmem:[%s2172_s3 + $0x218] sm:$0xff] }
 0xc56   : > { %1193 = vmatpush.msra.mxu0 %v1173_v39 }
 0xc57   : > { %v1063_v43 = vsel %vm226_vm6, %v2057_v42, 0.0  ;;  %v1071_v44 = vmul.f32 %v2057_v42, %v2057_v42 }
 0xc58   : > { %1064 = vadd.xlane.f32.xlu0 %v1063_v43  ;;  %v1023_v47 = vpop.f32.mrf.mxu1  ;;  %v1170_v43 = vld [vmem:[%s2172_s3 + $0x210] sm:$0xff] }
 0xc59   : > { %v1053_v48 = vadd.f32 %v1052_v45, %v1023_v47  ;;  %v1073_v49 = vsel %vm226_vm6, %v1071_v44, 0.0  ;;  %v1169_v44 = vld [vmem:[%s2172_s3 + $0x208] sm:$0xff]  ;;  %v1168_v45 = vld [vmem:[%s2172_s3 + $0x200] sm:$0xff]  ;;  %v1560_v47 = vld [vmem:[%s2172_s3 + $0x1f8] ss:$0 sm:$0xff] }
 0xc5a   : > { %1074 = vadd.xlane.f32.xlu2 %v1073_v49 }
 0xc5b   : > { %v1056_v50 = vadd.f32 %v1053_v48, %v1989_v31  ;;  %v1117_v31 = vld [vmem:[%s2172_s3 + $0x1e8] sm:$0xff] }
 0xc5c   : > { %1142 = vmatpush.msrb.mxu2 %v1117_v31 }
 0xc5d   : > { %v2065_v51 = vadd.f32 %v1557_v40, %v1056_v50  ;;  %v1172_v40 = vld [vmem:[%s2172_s3 + $0x220] sm:$0xff] }
 0xc5e   : > { %1370 = vmatpush.msra.mxu2 %v1609_v59  ;;  %1194 = vmatpush.msra.mxu0 %v1172_v40 }
 0xc5f   : > { %v1072_v52 = vmul.f32 %v2065_v51, %v2065_v51  ;;  %v1066_v54 = vsel %vm226_vm6, %v2065_v51, 0.0 }
 0xc60   : > { %1371 = vmatpush.msra.mxu2 %v1610_v38  ;;  %1195 = vmatpush.msra.mxu0 %v1171_v41 }
 0xc61   : > { %v1076_v53 = vsel %vm226_vm6, %v1072_v52, 0.0 }
 0xc62   : > { %1077 = vadd.xlane.f32.xlu1 %v1076_v53  ;;  %1067 = vadd.xlane.f32.xlu2 %v1066_v54 }
 0xc63   : > { %1196 = vmatpush.msra.mxu0 %v1170_v43 }
 0xc65   : > { %1197 = vmatpush.msra.mxu0 %v1169_v44 }
 0xc67   : > { %1198 = vmatpush.msra.mxu0 %v1168_v45 }
 0xccb   : > { %v1065_v56 = vpop.xlane.xlu0 %1064 }
 0xccc   : > { %v1069_v57 = vmul.f32 %v1065_v56, %v2001_v46 }
 0xccd   : > { %v1075_v60 = vpop.xlane.xlu2 %1074 }
 0xcce   : > { %v1083_v61 = vmul.f32 %v1069_v57, %v1069_v57  ;;  %v1079_v62 = vmul.f32 %v1075_v60, %v2001_v46  ;;  %v1081_v12 = vsub.f32 %v2057_v42, %v1069_v57 }
 0xcd0   : > { %v1085_v63 = vsub.f32 %v1079_v62, %v1083_v61 }
 0xcd2   : > { %v1087_v0 = vadd.f32 1e-05, %v1085_v63 }
 0xcd4   : > { %1601 = vrsqrt.f32 %v1087_v0  ;;  %vm1095_vm5 = vweird.f32 %v1087_v0 }
 0xcd5   : > { %v1078_v1 = vpop.xlane.xlu1 %1077  ;;  %v1068_v2 = vpop.xlane.xlu2 %1067 }
 0xcd6   : > { %v1070_v3 = vmul.f32 %v1068_v2, %v2001_v46  ;;  %v1080_v4 = vmul.f32 %v1078_v1, %v2001_v46 }
 0xcd8   : > { %v1084_v58 = vmul.f32 %v1070_v3, %v1070_v3  ;;  %v1082_v29 = vsub.f32 %v2065_v51, %v1070_v3 }
 0xcda   : > { %v1602_v18 = vpop.eup %1601  ;;  %v1086_v6 = vsub.f32 %v1080_v4, %v1084_v58 }
 0xcdb   : > { %v1090_v20 = vmul.f32 %v1602_v18, %v1087_v0  ;;  %vm1096_vm4 = vweird.f32 %v1602_v18 }
 0xcdc   : > { %v1088_v7 = vadd.f32 1e-05, %v1086_v6  ;;  %vm1097_vm7 = vmor %vm1095_vm5, %vm1096_vm4  ;;  %vm1275_vm4 = vcmp.eq.s32.totalorder %v1959_v5, 10  ;;  %vm1282_vm5 = vcmp.eq.s32.totalorder %v1959_v5, 11  ;;  %v1561_v5 = vld [vmem:[%s2172_s3 + $0x240] ss:$0 sm:$0xff] }
 0xcdd   : > { %v1091_v23 = vmul.f32 %v1602_v18, %v1090_v20  ;;  %v1243_v20 = vstv %s1242_s19 }
 0xcde   : > { %1603 = vrsqrt.f32 %v1088_v7  ;;  %vm1105_vm9 = vweird.f32 %v1088_v7 }
 0xcdf   : > { %v1092_v8 = vmul.f32 0.5, %v1091_v23  ;;  %v1250_v23 = vstv %s1249_s25 }
 0xce1   : > { %v1093_v25 = vsub.f32 1.5, %v1092_v8 }
 0xce3   : > { %v1094_v10 = vmul.f32 %v1602_v18, %v1093_v25  ;;  %v1257_v25 = vstv %s1256_s26 }
 0xce4   : > { %v1604_v11 = vpop.eup %1603 }
 0xce5   : > { %v1098_v46 = vsel %vm1097_vm7, %v1602_v18, %v1094_v10  ;;  %v1100_v14 = vmul.f32 %v1604_v11, %v1088_v7  ;;  %vm1106_vm8 = vweird.f32 %v1604_v11  ;;  %v1236_v18 = vstv %s1235_s24  ;;  %s154_s24 = scalar_lea.vmem %s2173_s4, %s1706_s29 }
 0xce6   : > { %v1109_v15 = vmul.f32 %v1098_v46, %v1081_v12  ;;  %vm1107_vm10 = vmor %vm1105_vm9, %vm1106_vm8  ;;  %v1237_v6 = vsel %vm1232_vm12, %v1236_v18, %v1748_v17  ;;  %v1264_v17 = vstv %s1263_s5  ;;  %v1271_v12 = vstv %s1270_s7 }
 0xce7   : > { %v1101_v19 = vmul.f32 %v1604_v11, %v1100_v14  ;;  %v1244_v7 = vsel %vm1239_vm13, %v1243_v20, %v1237_v6  ;;  %v1278_v46 = vstv %s1277_s8  ;;  %v1285_v14 = vstv %s1284_s9 }
 0xce8   : > { %v1112_v21 = vmul.f32 %v1558_v13, %v1109_v15  ;;  %v1251_v8 = vsel %vm1246_vm14, %v1250_v23, %v1244_v7  ;;  %vm1384_vm8 = vcmask 388096  }
 0xce9   : > { %v1102_v22 = vmul.f32 0.5, %v1101_v19  ;;  %v1258_v10 = vsel %vm1253_vm15, %v1257_v25, %v1251_v8 }
 0xcea   : > { %v1115_v24 = vadd.f32 %v1559_v16, %v1112_v21  ;;  %vm1288_vm1 = vcmp.eq.s32.totalorder %v1773_v27, %v1258_v10  ;;  %v1324_v21 = vld [vmem:[%s2172_s3 + $0x250] sm:$0xff] }
 0xceb   : > { %v1103_v26 = vsub.f32 1.5, %v1102_v22  ;;  %1347 = vmatpush.msra.mxu3 %v1324_v21 }
 0xcec   : > { %1495 = vmatmul.msk.f32.vlgmr.msrb.gmra.mxu2 %vm226_vm6, %v1115_v24 }
 0xced   : > { %v1104_v28 = vmul.f32 %v1604_v11, %v1103_v26 }
 0xcef   : > { %v1108_v30 = vsel %vm1107_vm10, %v1604_v11, %v1104_v28  ;;  %v1499_v11 = vsel %vm1288_vm1, 1.0, %v1647_v36 }
 0xcf0   : > { %v1110_v32 = vmul.f32 %v1108_v30, %v1082_v29 }
 0xcf2   : > { %v1113_v33 = vmul.f32 %v1558_v13, %v1110_v32  ;;  %v1266_v13 = vsel %vm1261_vm2, %v1264_v17, 4294967295  ;;  %v1562_v32 = vld [vmem:[%s2172_s3 + $0x258] ss:$0 sm:$0xff] }
 0xcf3   : > { %v1273_v9 = vsel %vm1268_vm3, %v1271_v12, %v1266_v13 }
 0xcf4   : > { %v1116_v34 = vadd.f32 %v1559_v16, %v1113_v33  ;;  %v1280_v15 = vsel %vm1275_vm4, %v1278_v46, %v1273_v9 }
 0xcf5   : > { %v1287_v16 = vsel %vm1282_vm5, %v1285_v14, %v1280_v15 }
 0xcf6   : > { %1496 = vmatmul.msk.f32.gmra.mxu2 %vm226_vm6, %v1116_v34  ;;  %vm1289_vm7 = vcmp.eq.s32.totalorder %v1773_v27, %v1287_v16 }
 0xcf7   : > { %v1500_v19 = vsel %vm1289_vm7, 1.0, %v1647_v36  ;;  %v1323_v36 = vld [vmem:[%s2172_s3 + $0x248] sm:$0xff] }
 0xcf8   : > { %1348 = vmatpush.msra.mxu3 %v1323_v36 }
 0xcfe   : > { %1505 = vmatmul.msk.f32.vlgmr.msra.gmra.mxu2 %vm226_vm6, %v1499_v11 }
 0xd06   : > { %1506 = vmatmul.msk.f32.gmra.mxu2 %vm226_vm6, %v1500_v19 }
 0xd6f   : > { %v1144_v48 = vpop.f32.mrf.mxu2 }
 0xd70   : > { %v1145_v49 = vadd.f32 %v1560_v47, %v1144_v48 }
 0xd72   : > { %v1150_v50 = vmul.f32 %v1145_v49, %v1145_v49 }
 0xd74   : > { %v1152_v52 = vmul.f32 %v1150_v50, %v1145_v49 }
 0xd76   : > { %v1154_v53 = vmul.f32 0.044715, %v1152_v52 }
 0xd78   : > { %v1156_v54 = vadd.f32 %v1154_v53, %v1145_v49 }
 0xd79   : > { %v1147_v55 = vpop.f32.mrf.mxu2 }
 0xd7a   : > { %v1158_v31 = vmul.f32 0.7978846, %v1156_v54  ;;  %v1148_v56 = vadd.f32 %v1560_v47, %v1147_v55 }
 0xd7c   : > { %1605 = vtanh.f32 %v1158_v31  ;;  %v1151_v57 = vmul.f32 %v1148_v56, %v1148_v56 }
 0xd7e   : > { %v1153_v59 = vmul.f32 %v1151_v57, %v1148_v56 }
 0xd80   : > { %v1155_v60 = vmul.f32 0.044715, %v1153_v59 }
 0xd82   : > { %v1606_v61 = vpop.eup %1605  ;;  %v1157_v62 = vadd.f32 %v1155_v60, %v1148_v56 }
 0xd83   : > { %v1162_v38 = vadd.f32 1.0, %v1606_v61 }
 0xd84   : > { %v1159_v63 = vmul.f32 0.7978846, %v1157_v62 }
 0xd85   : > { %v1164_v0 = vmul.f32 0.5, %v1162_v38 }
 0xd86   : > { %1607 = vtanh.f32 %v1159_v63 }
 0xd87   : > { %v1166_v1 = vmul.f32 %v1164_v0, %v1145_v49 }
 0xd89   : > { %1497 = vmatmul.msk.f32.vlgmr.msra.gmra.mxu0 %vm1176_vm11, %v1166_v1 }
 0xd8c   : > { %v1608_v2 = vpop.eup %1607 }
 0xd8d   : > { %v1163_v3 = vadd.f32 1.0, %v1608_v2 }
 0xd8f   : > { %v1165_v4 = vmul.f32 0.5, %v1163_v3 }
 0xd91   : > { %v1167_v58 = vmul.f32 %v1165_v4, %v1148_v56 }
 0xd93   : > { %1498 = vmatmul.msk.f32.gmra.mxu0 %vm1176_vm11, %v1167_v58 }
 0xe06   : > { %v1200_v22 = vpop.f32.mrf.mxu0 }
 0xe07   : > { %v1206_v26 = vadd.f32 %v1200_v22, %v2057_v42 }
 0xe09   : > { %v1210_v29 = vadd.f32 %v1561_v5, %v1206_v26 }
 0xe10   : > { %v1203_v24 = vpop.f32.mrf.mxu0 }
 0xe11   : > { %v1207_v28 = vadd.f32 %v1203_v24, %v2065_v51  ;;  %v1373_v51 = vpop.f32.mrf.mxu2 }
 0xe13   : > { %v1211_v27 = vadd.f32 %v1561_v5, %v1207_v28 }
 0xe15   : > { %1314 = vmatpush.msra.mxu1 %v1211_v27 }
 0xe17   : > { %1315 = vmatpush.msra.mxu1 %v1210_v29 }
 0xe18   : > { %1501 = vmatmul.msk.f32.vlgmr.msra.gmra.mxu1 %vm226_vm6, %v1499_v11 }
 0xe19   : > { %v1376_v39 = vpop.f32.mrf.mxu2 }
 0xe20   : > { %1502 = vmatmul.msk.f32.gmra.mxu1 %vm226_vm6, %v1500_v19 }
 0xe95   : > { %v1317_v42 = vpop.f32.mrf.mxu1 }
 0xe96   : > { %1503 = vmatmul.msk.f32.vlgmr.msra.gmra.mxu3 %vm226_vm6, %v1317_v42 }
 0xe9d   : > { %v1320_v30 = vpop.f32.mrf.mxu1 }
 0xe9e   : > { %1504 = vmatmul.msk.f32.gmra.mxu3 %vm226_vm6, %v1320_v30  ;;  %vm1398_vm6 = vcmask 0  }
 0xf19   : > { %v1350_v33 = vpop.f32.mrf.mxu3 }
 0xf1a   : > { %v1351_v34 = vadd.f32 %v1562_v32, %v1350_v33 }
 0xf1c   : > { %v1379_v35 = vsub.f32 %v1351_v34, %v1373_v51 }
 0xf1e   : > { %v1381_v41 = vmul.f32 %v1379_v35, %v1379_v35 }
 0xf20   : > { %v1383_v45 = vsel %vm165_vm0, %v1381_v41, 0.0 }
 0xf21   : > { %v1353_v37 = vpop.f32.mrf.mxu3 }
 0xf22   : > { %v1354_v40 = vadd.f32 %v1562_v32, %v1353_v37 }
 0xf24   : > { %v1380_v43 = vsub.f32 %v1354_v40, %v1376_v39 }
 0xf26   : > { %v1382_v44 = vmul.f32 %v1380_v43, %v1380_v43 }
 0xf28   : > { %v1385_v47 = vsel %vm1384_vm8, %v1382_v44, 0.0 }
 0xf29   : > { %v1386_v48 = vadd.f32 %v1385_v47, %v1383_v45 }
 0xf2b   : > { %1387 = vadd.xlane.f32.xlu2 %v1386_v48 }
 0xf9e   : > { %v1388_v49 = vpop.xlane.xlu2 %1387 }
 0xf9f   : > { %v1389_v50 = vrot.slane %v1388_v49, 4 }
 0xfa1   : > { %v1390_v52 = vadd.f32 %v1389_v50, %v1388_v49 }
 0xfa3   : > { %v1391_v53 = vrot.slane %v1390_v52, 2 }
 0xfa5   : > { %v1392_v54 = vadd.f32 %v1391_v53, %v1390_v52 }
 0xfa7   : > { %v1393_v55 = vrot.slane %v1392_v54, 1 }
 0xfa9   : > { %v1394_v31 = vadd.f32 %v1393_v55, %v1392_v54 }
 0xfab   : > { %1512 = vpush %v1394_v31 }
 0xfdc   : > { %s1513_s22 = spop %1512 }
 0xfdd   : > { %v1396_v56 = vstv %s1513_s22 }
 0xfde   : > { %v1397_v57 = vmul.f32 0.00086805556, %v1396_v56 }
 0xfe0   : > { %1399 = vst.msk [vmem:[%s154_s24] sm:$0x1] %vm1398_vm6, %v1397_v57 }
 0xfe1 PF: > { %s27_s23 = sadd.s32 1, %s1643_s23  }
 0xfe2   : > { %p24_p4 = scmp.ge.s32.totalorder %s27_s23, 4  }
 0xfe4   :  { %26 = sbr.rel (!%p24_p4) target bundleno = 8 (0x8), region = 58 }

</bundles_post_ra>
